<compile_context>
chip_gen: v7x
topology: tpu7x:2x2x1
jax: 0.10.0
libtpu: 0.0.40
codegen_flags: <defaults>
</compile_context>

<pallas_src>
import math
from functools import partial

import jax
import jax.numpy as jnp
from jax import lax
from jax.experimental import pallas as pl
from jax.experimental.pallas import tpu as pltpu

EPS = 1e-6


# ------------------------------- tiling helper ------------------------------ #

def _tile(dim, target, align):
    """Largest align-multiple divisor of `dim` that is <= target, else full dim."""
    if dim <= target:
        return dim
    t = (target // align) * align
    while t >= align:
        if dim % t == 0:
            return t
        t -= align
    return dim


# ----------------------------- Pallas kernels ------------------------------ #

def layernorm_kernel(x_ref, a_ref, b_ref, o_ref, *, eps, n_features):
    x = x_ref[...].astype(jnp.float32)                      # (tm, D)
    mean = jnp.mean(x, axis=-1, keepdims=True)
    # torch.Tensor.std: unbiased (n-1); eps added to the std, not the variance.
    var = jnp.sum((x - mean) ** 2, axis=-1, keepdims=True) / (n_features - 1)
    std = jnp.sqrt(var)
    y = a_ref[...] * (x - mean) / (std + eps) + b_ref[...]
    o_ref[...] = y.astype(o_ref.dtype)


def ln_linear_kernel(x_ref, a_ref, b_ref, w_ref, wb_ref, o_ref, *,
                     eps, n_features, activation):
    """Fused LayerNorm prologue + matmul (+ bias, optional ReLU)."""
    x = x_ref[...]                                          # (tm, K), native dtype
    xf = x.astype(jnp.float32)
    mean = jnp.mean(xf, axis=-1, keepdims=True)
    var = jnp.sum((xf - mean) ** 2, axis=-1, keepdims=True) / (n_features - 1)
    std = jnp.sqrt(var)
    h = a_ref[...] * (xf - mean) / (std + eps) + b_ref[...]
    h = h.astype(x.dtype)                                   # keep MXU operand narrow
    y = jnp.dot(h, w_ref[...], preferred_element_type=jnp.float32) + wb_ref[...]
    if activation == "relu":
        y = jnp.maximum(y, 0.0)
    o_ref[...] = y.astype(o_ref.dtype)


def linear_kernel(x_ref, w_ref, b_ref, o_ref, acc_ref, *, activation):
    """K-tiled matmul with f32 accumulator; bias (+ optional ReLU) on finalize."""
    @pl.when(pl.program_id(2) == 0)
    def _init():
        acc_ref[...] = jnp.zeros_like(acc_ref)

    acc_ref[...] += jnp.dot(x_ref[...], w_ref[...],
                            preferred_element_type=jnp.float32)

    @pl.when(pl.program_id(2) == pl.num_programs(2) - 1)
    def _finalize():
        y = acc_ref[...] + b_ref[...]
        if activation == "relu":
            y = jnp.maximum(y, 0.0)
        o_ref[...] = y.astype(o_ref.dtype)


def linear_residual_kernel(x_ref, w_ref, b_ref, r_ref, o_ref, acc_ref):
    """K-tiled matmul with f32 accumulator; bias + residual add on finalize."""
    @pl.when(pl.program_id(2) == 0)
    def _init():
        acc_ref[...] = jnp.zeros_like(acc_ref)

    acc_ref[...] += jnp.dot(x_ref[...], w_ref[...],
                            preferred_element_type=jnp.float32)

    @pl.when(pl.program_id(2) == pl.num_programs(2) - 1)
    def _finalize():
        y = acc_ref[...] + b_ref[...] + r_ref[...].astype(jnp.float32)
        o_ref[...] = y.astype(o_ref.dtype)


def _mha_core(q, k, v, mask, n_heads, d_head, scale, out_dtype):
    """All-heads attention on lane-dense (T, D) blocks for one batch element."""
    neg = jnp.float32(-1e9)
    outs = []
    for h in range(n_heads):                                # static unroll
        lo = h * d_head
        qh = q[:, lo:lo + d_head]                           # (Tq, Dh)
        kh = k[:, lo:lo + d_head]                           # (S, Dh)
        vh = v[:, lo:lo + d_head]                           # (S, Dh)
        # contract on Dh of both operands: no explicit k.T / relayout.
        s = lax.dot_general(qh, kh, (((1,), (1,)), ((), ())),
                            preferred_element_type=jnp.float32) * scale
        s = jnp.where(mask == 0, neg, s)                    # masked_fill(mask==0,-1e9)
        s_max = jnp.max(s, axis=-1, keepdims=True)
        p = jnp.exp(s - s_max)
        denom = jnp.sum(p, axis=-1, keepdims=True)
        p = p * pl.reciprocal(denom, approx=True)           # divide on EUP slot
        outs.append(jnp.dot(p.astype(v.dtype), vh,
                            preferred_element_type=jnp.float32))
    return jnp.concatenate(outs, axis=-1).astype(out_dtype)  # (Tq, D) lane-dense


def attn_self_kernel(qkv_ref, mask_ref, o_ref, *, n_heads, d_head, scale):
    d = n_heads * d_head
    qkv = qkv_ref[0]                                        # (T, 3D)
    q = qkv[:, 0:d]
    k = qkv[:, d:2 * d]
    v = qkv[:, 2 * d:3 * d]
    o_ref[0] = _mha_core(q, k, v, mask_ref[0], n_heads, d_head, scale, o_ref.dtype)


def attn_cross_kernel(q_ref, kv_ref, mask_ref, o_ref, *, n_heads, d_head, scale):
    d = n_heads * d_head
    q = q_ref[0]                                            # (T, D)
    kv = kv_ref[0]                                          # (S, 2D)
    k = kv[:, 0:d]
    v = kv[:, d:2 * d]
    o_ref[0] = _mha_core(q, k, v, mask_ref[0], n_heads, d_head, scale, o_ref.dtype)


# ------------------------------ kernel wrappers ----------------------------- #

def pallas_layernorm(x, a, b, tm_target=512):
    B, T, D = x.shape
    M = B * T
    tm = _tile(M, tm_target, 8)
    out = pl.pallas_call(
        partial(layernorm_kernel, eps=EPS, n_features=D),
        out_shape=jax.ShapeDtypeStruct((M, D), x.dtype),
        grid=(M // tm,),
        in_specs=[
            pl.BlockSpec((tm, D), lambda i: (i, 0)),
            pl.BlockSpec((1, D), lambda i: (0, 0)),
            pl.BlockSpec((1, D), lambda i: (0, 0)),
        ],
        out_specs=pl.BlockSpec((tm, D), lambda i: (i, 0)),
        compiler_params=pltpu.CompilerParams(dimension_semantics=("parallel",)),
    )(x.reshape(M, D), a.reshape(1, D), b.reshape(1, D))
    return out.reshape(B, T, D)


def pallas_ln_linear(x2d, ln_a, ln_b, w, wb, activation=None,
                     tm_target=256, tn_target=512):
    """y = LayerNorm(x) @ w + wb, optional ReLU.  LN needs full K per row tile."""
    M, K = x2d.shape
    N = w.shape[1]
    tm = _tile(M, tm_target, 8)
    tn = _tile(N, tn_target, 128)
    return pl.pallas_call(
        partial(ln_linear_kernel, eps=EPS, n_features=K, activation=activation),
        out_shape=jax.ShapeDtypeStruct((M, N), x2d.dtype),
        grid=(M // tm, N // tn),
        in_specs=[
            pl.BlockSpec((tm, K), lambda i, j: (i, 0)),
            pl.BlockSpec((1, K), lambda i, j: (0, 0)),
            pl.BlockSpec((1, K), lambda i, j: (0, 0)),
            pl.BlockSpec((K, tn), lambda i, j: (0, j)),
            pl.BlockSpec((1, tn), lambda i, j: (0, j)),
        ],
        out_specs=pl.BlockSpec((tm, tn), lambda i, j: (i, j)),
        compiler_params=pltpu.CompilerParams(
            dimension_semantics=("parallel", "parallel")),
    )(x2d, ln_a.reshape(1, K), ln_b.reshape(1, K), w, wb.reshape(1, N))


def pallas_linear(x2d, w, b, residual=None, activation=None,
                  tm_target=256, tn_target=512, tk_target=512):
    """y = x @ w + b (+ residual) with a K-tiled, accumulator-based grid."""
    M, K = x2d.shape
    N = w.shape[1]
    tm = _tile(M, tm_target, 8)
    tn = _tile(N, tn_target, 128)
    tk = _tile(K, tk_target, 128)
    in_specs = [
        pl.BlockSpec((tm, tk), lambda i, j, k: (i, k)),
        pl.BlockSpec((tk, tn), lambda i, j, k: (k, j)),
        pl.BlockSpec((1, tn), lambda i, j, k: (0, j)),
    ]
    args = [x2d, w, b.reshape(1, N)]
    if residual is not None:
        kern = linear_residual_kernel
        in_specs.append(pl.BlockSpec((tm, tn), lambda i, j, k: (i, j)))
        args.append(residual)
    else:
        kern = partial(linear_kernel, activation=activation)
    return pl.pallas_call(
        kern,
        out_shape=jax.ShapeDtypeStruct((M, N), x2d.dtype),
        grid=(M // tm, N // tn, K // tk),
        in_specs=in_specs,
        out_specs=pl.BlockSpec((tm, tn), lambda i, j, k: (i, j)),
        scratch_shapes=[pltpu.VMEM((tm, tn), jnp.float32)],
        compiler_params=pltpu.CompilerParams(
            dimension_semantics=("parallel", "parallel", "arbitrary")),
    )(*args)


def _mask_spec(mask, B):
    Bm, Tm, S = mask.shape
    if Bm == B:
        return pl.BlockSpec((1, Tm, S), lambda bb: (bb, 0, 0))
    return pl.BlockSpec((1, Tm, S), lambda bb: (0, 0, 0))


def pallas_self_attention(qkv, mask, n_heads):
    # qkv: (B, T, 3D); mask: (Bm, Tm, T) with Bm in {1,B}, Tm in {1,T}
    B, T, threeD = qkv.shape
    D = threeD // 3
    Dh = D // n_heads
    scale = 1.0 / math.sqrt(Dh)
    mask = mask.astype(jnp.int32)
    return pl.pallas_call(
        partial(attn_self_kernel, n_heads=n_heads, d_head=Dh, scale=scale),
        out_shape=jax.ShapeDtypeStruct((B, T, D), qkv.dtype),
        grid=(B,),
        in_specs=[
            pl.BlockSpec((1, T, threeD), lambda bb: (bb, 0, 0)),
            _mask_spec(mask, B),
        ],
        out_specs=pl.BlockSpec((1, T, D), lambda bb: (bb, 0, 0)),
        compiler_params=pltpu.CompilerParams(dimension_semantics=("parallel",)),
    )(qkv, mask)


def pallas_cross_attention(q, kv, mask, n_heads):
    # q: (B, T, D); kv: (B, S, 2D); mask: (Bm, Tm, S)
    B, T, D = q.shape
    S = kv.shape[1]
    Dh = D // n_heads
    scale = 1.0 / math.sqrt(Dh)
    mask = mask.astype(jnp.int32)
    return pl.pallas_call(
        partial(attn_cross_kernel, n_heads=n_heads, d_head=Dh, scale=scale),
        out_shape=jax.ShapeDtypeStruct((B, T, D), q.dtype),
        grid=(B,),
        in_specs=[
            pl.BlockSpec((1, T, D), lambda bb: (bb, 0, 0)),
            pl.BlockSpec((1, S, 2 * D), lambda bb: (bb, 0, 0)),
            _mask_spec(mask, B),
        ],
        out_specs=pl.BlockSpec((1, T, D), lambda bb: (bb, 0, 0)),
        compiler_params=pltpu.CompilerParams(dimension_semantics=("parallel",)),
    )(q, kv, mask)


# --------------------------- model (glue, plain JAX) ------------------------ #

def decoder_layer(x, memory, src_mask, tgt_mask, lp, n_heads):
    B, T, D = x.shape
    S = memory.shape[1]
    x2 = x.reshape(B * T, D)
    mem2 = memory.reshape(B * S, D)

    # sublayer 0: x + self_attn(norm(x), tgt_mask)   [LN fused into QKV proj]
    qkv = pallas_ln_linear(x2, *lp["ln0"], lp["w_qkv"], lp["b_qkv"])
    attn = pallas_self_attention(qkv.reshape(B, T, 3 * D), tgt_mask, n_heads)
    x2 = pallas_linear(attn.reshape(B * T, D), lp["w_self_o"], lp["b_self_o"],
                       residual=x2)

    # sublayer 1: x + src_attn(norm(x), memory, src_mask)
    q = pallas_ln_linear(x2, *lp["ln1"], lp["w_src_q"], lp["b_src_q"])
    kv = pallas_linear(mem2, lp["w_src_kv"], lp["b_src_kv"])
    attn = pallas_cross_attention(q.reshape(B, T, D), kv.reshape(B, S, 2 * D),
                                  src_mask, n_heads)
    x2 = pallas_linear(attn.reshape(B * T, D), lp["w_src_o"], lp["b_src_o"],
                       residual=x2)

    # sublayer 2: x + FFN(norm(x))                   [LN + ReLU fused]
    h = pallas_ln_linear(x2, *lp["ln2"], lp["w_ff1"], lp["b_ff1"],
                         activation="relu")
    x2 = pallas_linear(h, lp["w_ff2"], lp["b_ff2"], residual=x2)

    return x2.reshape(B, T, D)


def decoder_forward(x, memory, src_mask, tgt_mask, params, n_heads):
    layers, (fa, fb) = params
    for lp in layers:
        x = decoder_layer(x, memory, src_mask, tgt_mask, lp, n_heads)
    return pallas_layernorm(x, fa, fb)


# --------------------------- pure-JAX reference ----------------------------- #

def _ref_layernorm(x, a, b):
    mean = jnp.mean(x, axis=-1, keepdims=True)
    var = jnp.sum((x - mean) ** 2, axis=-1, keepdims=True) / (x.shape[-1] - 1)
    std = jnp.sqrt(var)
    return a.reshape(1, 1, -1) * (x - mean) / (std + EPS) + b.reshape(1, 1, -1)


def _ref_attention(q, k, v, mask, n_heads):
    B, T, D = q.shape
    S = k.shape[1]
    Dh = D // n_heads
    q = q.reshape(B, T, n_heads, Dh).transpose(0, 2, 1, 3)
    k = k.reshape(B, S, n_heads, Dh).transpose(0, 2, 1, 3)
    v = v.reshape(B, S, n_heads, Dh).transpose(0, 2, 1, 3)
    s = jnp.einsum("bhqd,bhkd->bhqk", q, k) / math.sqrt(Dh)
    s = jnp.where(mask[:, None, :, :] == 0, -1e9, s)
    p = jax.nn.softmax(s, axis=-1)
    o = jnp.einsum("bhqk,bhkd->bhqd", p, v)
    return o.transpose(0, 2, 1, 3).reshape(B, T, D)


def _ref_decoder(x, memory, src_mask, tgt_mask, params, n_heads):
    layers, (fa, fb) = params
    D = x.shape[-1]
    for lp in layers:
        n = _ref_layernorm(x, *lp["ln0"])
        qkv = n @ lp["w_qkv"] + lp["b_qkv"]
        a = _ref_attention(qkv[..., :D], qkv[..., D:2 * D], qkv[..., 2 * D:],
                           tgt_mask, n_heads)
        x = x + (a @ lp["w_self_o"] + lp["b_self_o"])

        n = _ref_layernorm(x, *lp["ln1"])
        q = n @ lp["w_src_q"] + lp["b_src_q"]
        kv = memory @ lp["w_src_kv"] + lp["b_src_kv"]
        a = _ref_attention(q, kv[..., :D], kv[..., D:], src_mask, n_heads)
        x = x + (a @ lp["w_src_o"] + lp["b_src_o"])

        n = _ref_layernorm(x, *lp["ln2"])
        h = jnp.maximum(n @ lp["w_ff1"] + lp["b_ff1"], 0.0)
        x = x + (h @ lp["w_ff2"] + lp["b_ff2"])
    return _ref_layernorm(x, fa, fb)


# ------------------------------- init / main -------------------------------- #

def init_params(key, d_model, d_ff, n_layers):
    keys = iter(jax.random.split(key, n_layers * 20 + 2))

    def lin_p(n_in, n_out):
        # weights pre-transposed to (in, out) so no w.T at runtime
        w = 0.05 * jax.random.normal(next(keys), (n_in, n_out), dtype=jnp.float32)
        b = 0.05 * jax.random.normal(next(keys), (1, n_out), dtype=jnp.float32)
        return w, b

    layers = []
    for _ in range(n_layers):
        lp = {}
        wq, bq = lin_p(d_model, d_model)
        wk, bk = lin_p(d_model, d_model)
        wv, bv = lin_p(d_model, d_model)
        lp["w_qkv"] = jnp.concatenate([wq, wk, wv], axis=1)      # (D, 3D)
        lp["b_qkv"] = jnp.concatenate([bq, bk, bv], axis=1)
        lp["w_self_o"], lp["b_self_o"] = lin_p(d_model, d_model)
        lp["w_src_q"], lp["b_src_q"] = lin_p(d_model, d_model)
        wk2, bk2 = lin_p(d_model, d_model)
        wv2, bv2 = lin_p(d_model, d_model)
        lp["w_src_kv"] = jnp.concatenate([wk2, wv2], axis=1)     # (D, 2D)
        lp["b_src_kv"] = jnp.concatenate([bk2, bv2], axis=1)
        lp["w_src_o"], lp["b_src_o"] = lin_p(d_model, d_model)
        lp["w_ff1"], lp["b_ff1"] = lin_p(d_model, d_ff)
        lp["w_ff2"], lp["b_ff2"] = lin_p(d_ff, d_model)
        for i in range(3):
            lp[f"ln{i}"] = (jnp.ones((1, d_model), jnp.float32),
                            jnp.zeros((1, d_model), jnp.float32))
        layers.append(lp)
    final_ln = (jnp.ones((d_model,), jnp.float32),
                jnp.zeros((d_model,), jnp.float32))
    return layers, final_ln


if __name__ == "__main__":
    B, T, S, D, D_FF, H, N = 2, 8, 8, 32, 64, 4, 2

    key = jax.random.PRNGKey(0)
    kx, km, kp = jax.random.split(key, 3)
    x = jax.random.normal(kx, (B, T, D), dtype=jnp.float32)
    memory = jax.random.normal(km, (B, S, D), dtype=jnp.float32)
    tgt_mask = jnp.tril(jnp.ones((T, T), jnp.int32))[None]   # (1, T, T) causal
    src_mask = jnp.ones((B, 1, S), jnp.int32)                # (B, 1, S) padding

    params = init_params(kp, D, D_FF, N)

    fwd = jax.jit(decoder_forward, static_argnums=(5,))
    out = fwd(x, memory, src_mask, tgt_mask, params, H)
    out = jax.block_until_ready(out)

    assert out.shape == (B, T, D)
    assert bool(jnp.all(jnp.isfinite(out)))

    # correctness check against a pure-JAX reference (approx reciprocal in the
    # softmax gives ~2^-12 relative error; loose tolerance accounts for it).
    ref = _ref_decoder(x, memory, src_mask, tgt_mask, params, H)
    assert bool(jnp.allclose(out, ref, rtol=1e-2, atol=1e-2))

    print("KERNEL_OK")
</pallas_src>

<mosaic_0001>
module attributes {stable_mosaic.version = 11 : i64} {
  func.func @linear_residual_kernel(%arg0: i32, %arg1: i32, %arg2: i32, %arg3: memref<16x32xf32, #tpu.memory_space<vmem>>, %arg4: memref<32x32xf32, #tpu.memory_space<vmem>>, %arg5: memref<1x32xf32, #tpu.memory_space<vmem>>, %arg6: memref<16x32xf32, #tpu.memory_space<vmem>>, %arg7: memref<16x32xf32, #tpu.memory_space<vmem>>, %arg8: memref<16x32xf32, #tpu.memory_space<vmem>>) attributes {dimension_semantics = [#tpu.dimension_semantics<parallel>, #tpu.dimension_semantics<parallel>, #tpu.dimension_semantics<arbitrary>], iteration_bounds = array<i64: 1, 1, 1>, scalar_prefetch = 0 : i64, scratch_operands = 1 : i64, tpu.core_type = #tpu.core_type<tc>, window_params = [{transform_indices = @transform_0, window_bounds = array<i64: 16, 32>}, {transform_indices = @transform_1, window_bounds = array<i64: 32, 32>}, {transform_indices = @transform_2, window_bounds = array<i64: 1, 32>}, {transform_indices = @transform_3, window_bounds = array<i64: 16, 32>}, {transform_indices = @transform_4, window_bounds = array<i64: 16, 32>}]} {
    %c0_i32 = arith.constant 0 : i32
    %0 = arith.cmpi eq, %arg2, %c0_i32 : i32
    %1 = arith.extui %0 : i1 to i32
    %c0_i32_0 = arith.constant 0 : i32
    %2 = arith.cmpi ne, %1, %c0_i32_0 : i32
    scf.if %2 {
      %cst_10 = arith.constant 0.000000e+00 : f32
      %12 = vector.broadcast %cst_10 : f32 to vector<16x32xf32>
      %c0_11 = arith.constant 0 : index
      %c0_12 = arith.constant 0 : index
      %13 = vector.load %arg8[%c0_11, %c0_12] : memref<16x32xf32, #tpu.memory_space<vmem>>, vector<16x32xf32>
      tpu.vector_store %arg8[%c0_11, %c0_12], %12 {strides = array<i32>} : memref<16x32xf32, #tpu.memory_space<vmem>>, vector<16x32xf32>,
    } else {
    }
    %c0 = arith.constant 0 : index
    %c0_1 = arith.constant 0 : index
    %3 = vector.load %arg8[%c0, %c0_1] : memref<16x32xf32, #tpu.memory_space<vmem>>, vector<16x32xf32>
    %c0_2 = arith.constant 0 : index
    %c0_3 = arith.constant 0 : index
    %4 = vector.load %arg3[%c0_2, %c0_3] : memref<16x32xf32, #tpu.memory_space<vmem>>, vector<16x32xf32>
    %c0_4 = arith.constant 0 : index
    %c0_5 = arith.constant 0 : index
    %5 = vector.load %arg4[%c0_4, %c0_5] : memref<32x32xf32, #tpu.memory_space<vmem>>, vector<32x32xf32>
    %cst = arith.constant dense<0.000000e+00> : vector<16x32xf32>
    %6 = tpu.matmul %4, %5, %cst {dimension_numbers = #tpu.dot_dimension_numbers<[1], [0], [0], [1], [0, 0, 1, 1], [], []>} : vector<16x32xf32>, vector<32x32xf32>, vector<16x32xf32> -> vector<16x32xf32>
    %7 = arith.addf %3, %6 : vector<16x32xf32>
    %c0_6 = arith.constant 0 : index
    %c0_7 = arith.constant 0 : index
    %8 = vector.load %arg8[%c0_6, %c0_7] : memref<16x32xf32, #tpu.memory_space<vmem>>, vector<16x32xf32>
    tpu.vector_store %arg8[%c0_6, %c0_7], %7 {strides = array<i32>} : memref<16x32xf32, #tpu.memory_space<vmem>>, vector<16x32xf32>,
    %c0_i32_8 = arith.constant 0 : i32
    %9 = arith.cmpi eq, %arg2, %c0_i32_8 : i32
    %10 = arith.extui %9 : i1 to i32
    %c0_i32_9 = arith.constant 0 : i32
    %11 = arith.cmpi ne, %10, %c0_i32_9 : i32
    scf.if %11 {
      %c0_10 = arith.constant 0 : index
      %c0_11 = arith.constant 0 : index
      %12 = vector.load %arg8[%c0_10, %c0_11] : memref<16x32xf32, #tpu.memory_space<vmem>>, vector<16x32xf32>
      %c0_12 = arith.constant 0 : index
      %c0_13 = arith.constant 0 : index
      %13 = vector.load %arg5[%c0_12, %c0_13] : memref<1x32xf32, #tpu.memory_space<vmem>>, vector<1x32xf32>
      %14 = vector.broadcast %13 : vector<1x32xf32> to vector<16x32xf32>
      %15 = arith.addf %12, %14 : vector<16x32xf32>
      %c0_14 = arith.constant 0 : index
      %c0_15 = arith.constant 0 : index
      %16 = vector.load %arg6[%c0_14, %c0_15] : memref<16x32xf32, #tpu.memory_space<vmem>>, vector<16x32xf32>
      %17 = arith.addf %15, %16 : vector<16x32xf32>
      %c0_16 = arith.constant 0 : index
      %c0_17 = arith.constant 0 : index
      %18 = vector.load %arg7[%c0_16, %c0_17] : memref<16x32xf32, #tpu.memory_space<vmem>>, vector<16x32xf32>
      tpu.vector_store %arg7[%c0_16, %c0_17], %17 {strides = array<i32>} : memref<16x32xf32, #tpu.memory_space<vmem>>, vector<16x32xf32>,
    } else {
    }
    return
  }
  func.func @transform_0(%arg0: i32, %arg1: i32, %arg2: i32) -> (i32, i32) {
    %c0_i32 = arith.constant 0 : i32
    return %arg0, %arg2 : i32, i32
  }
  func.func @transform_1(%arg0: i32, %arg1: i32, %arg2: i32) -> (i32, i32) {
    %c0_i32 = arith.constant 0 : i32
    return %arg2, %arg1 : i32, i32
  }
  func.func @transform_2(%arg0: i32, %arg1: i32, %arg2: i32) -> (i32, i32) {
    %c0_i32 = arith.constant 0 : i32
    %c0_i32_0 = arith.constant 0 : i32
    return %c0_i32, %arg1 : i32, i32
  }
  func.func @transform_3(%arg0: i32, %arg1: i32, %arg2: i32) -> (i32, i32) {
    %c0_i32 = arith.constant 0 : i32
    return %arg0, %arg1 : i32, i32
  }
  func.func @transform_4(%arg0: i32, %arg1: i32, %arg2: i32) -> (i32, i32) {
    %c0_i32 = arith.constant 0 : i32
    return %arg0, %arg1 : i32, i32
  }
}

module attributes {stable_mosaic.version = 11 : i64} {
  func.func @ln_linear_kernel(%arg0: i32, %arg1: i32, %arg2: memref<16x32xf32, #tpu.memory_space<vmem>>, %arg3: memref<1x32xf32, #tpu.memory_space<vmem>>, %arg4: memref<1x32xf32, #tpu.memory_space<vmem>>, %arg5: memref<32x32xf32, #tpu.memory_space<vmem>>, %arg6: memref<1x32xf32, #tpu.memory_space<vmem>>, %arg7: memref<16x32xf32, #tpu.memory_space<vmem>>) attributes {dimension_semantics = [#tpu.dimension_semantics<parallel>, #tpu.dimension_semantics<parallel>], iteration_bounds = array<i64: 1, 1>, scalar_prefetch = 0 : i64, scratch_operands = 0 : i64, tpu.core_type = #tpu.core_type<tc>, window_params = [{transform_indices = @transform_0, window_bounds = array<i64: 16, 32>}, {pipeline_mode = #tpu.pipeline_mode<synchronous>, transform_indices = @transform_1, window_bounds = array<i64: 1, 32>}, {pipeline_mode = #tpu.pipeline_mode<synchronous>, transform_indices = @transform_2, window_bounds = array<i64: 1, 32>}, {transform_indices = @transform_3, window_bounds = array<i64: 32, 32>}, {transform_indices = @transform_4, window_bounds = array<i64: 1, 32>}, {transform_indices = @transform_5, window_bounds = array<i64: 16, 32>}]} {
    %c0 = arith.constant 0 : index
    %c0_0 = arith.constant 0 : index
    %0 = vector.load %arg2[%c0, %c0_0] : memref<16x32xf32, #tpu.memory_space<vmem>>, vector<16x32xf32>
    %cst = arith.constant dense<0.000000e+00> : vector<16xf32>
    %1 = vector.multi_reduction <add>, %0, %cst [1] : vector<16x32xf32> to vector<16xf32>
    %2 = vector.shape_cast %1 : vector<16xf32> to vector<16x1xf32>
    %cst_1 = arith.constant 3.200000e+01 : f32
    %3 = vector.broadcast %cst_1 : f32 to vector<16x1xf32>
    %4 = arith.divf %2, %3 : vector<16x1xf32>
    %5 = vector.broadcast %4 : vector<16x1xf32> to vector<16x32xf32>
    %6 = arith.subf %0, %5 : vector<16x32xf32>
    %7 = arith.mulf %6, %6 : vector<16x32xf32>
    %cst_2 = arith.constant dense<0.000000e+00> : vector<16xf32>
    %8 = vector.multi_reduction <add>, %7, %cst_2 [1] : vector<16x32xf32> to vector<16xf32>
    %9 = vector.shape_cast %8 : vector<16xf32> to vector<16x1xf32>
    %cst_3 = arith.constant 3.100000e+01 : f32
    %10 = vector.broadcast %cst_3 : f32 to vector<16x1xf32>
    %11 = arith.divf %9, %10 : vector<16x1xf32>
    %12 = math.sqrt %11 : vector<16x1xf32>
    %c0_4 = arith.constant 0 : index
    %c0_5 = arith.constant 0 : index
    %13 = vector.load %arg3[%c0_4, %c0_5] : memref<1x32xf32, #tpu.memory_space<vmem>>, vector<1x32xf32>
    %14 = vector.broadcast %4 : vector<16x1xf32> to vector<16x32xf32>
    %15 = arith.subf %0, %14 : vector<16x32xf32>
    %16 = vector.broadcast %13 : vector<1x32xf32> to vector<16x32xf32>
    %17 = arith.mulf %16, %15 : vector<16x32xf32>
    %cst_6 = arith.constant 9.99999997E-7 : f32
    %18 = vector.broadcast %cst_6 : f32 to vector<16x1xf32>
    %19 = arith.addf %12, %18 : vector<16x1xf32>
    %20 = vector.broadcast %19 : vector<16x1xf32> to vector<16x32xf32>
    %21 = arith.divf %17, %20 : vector<16x32xf32>
    %c0_7 = arith.constant 0 : index
    %c0_8 = arith.constant 0 : index
    %22 = vector.load %arg4[%c0_7, %c0_8] : memref<1x32xf32, #tpu.memory_space<vmem>>, vector<1x32xf32>
    %23 = vector.broadcast %22 : vector<1x32xf32> to vector<16x32xf32>
    %24 = arith.addf %21, %23 : vector<16x32xf32>
    %c0_9 = arith.constant 0 : index
    %c0_10 = arith.constant 0 : index
    %25 = vector.load %arg5[%c0_9, %c0_10] : memref<32x32xf32, #tpu.memory_space<vmem>>, vector<32x32xf32>
    %cst_11 = arith.constant dense<0.000000e+00> : vector<16x32xf32>
    %26 = tpu.matmul %24, %25, %cst_11 {dimension_numbers = #tpu.dot_dimension_numbers<[1], [0], [0], [1], [0, 0, 1, 1], [], []>} : vector<16x32xf32>, vector<32x32xf32>, vector<16x32xf32> -> vector<16x32xf32>
    %c0_12 = arith.constant 0 : index
    %c0_13 = arith.constant 0 : index
    %27 = vector.load %arg6[%c0_12, %c0_13] : memref<1x32xf32, #tpu.memory_space<vmem>>, vector<1x32xf32>
    %28 = vector.broadcast %27 : vector<1x32xf32> to vector<16x32xf32>
    %29 = arith.addf %26, %28 : vector<16x32xf32>
    %c0_14 = arith.constant 0 : index
    %c0_15 = arith.constant 0 : index
    %30 = vector.load %arg7[%c0_14, %c0_15] : memref<16x32xf32, #tpu.memory_space<vmem>>, vector<16x32xf32>
    tpu.vector_store %arg7[%c0_14, %c0_15], %29 {strides = array<i32>} : memref<16x32xf32, #tpu.memory_space<vmem>>, vector<16x32xf32>,
    return
  }
  func.func @transform_0(%arg0: i32, %arg1: i32) -> (i32, i32) {
    %c0_i32 = arith.constant 0 : i32
    %c0_i32_0 = arith.constant 0 : i32
    return %arg0, %c0_i32 : i32, i32
  }
  func.func @transform_1(%arg0: i32, %arg1: i32) -> (i32, i32) {
    %c0_i32 = arith.constant 0 : i32
    %c0_i32_0 = arith.constant 0 : i32
    %c0_i32_1 = arith.constant 0 : i32
    return %c0_i32, %c0_i32_0 : i32, i32
  }
  func.func @transform_2(%arg0: i32, %arg1: i32) -> (i32, i32) {
    %c0_i32 = arith.constant 0 : i32
    %c0_i32_0 = arith.constant 0 : i32
    %c0_i32_1 = arith.constant 0 : i32
    return %c0_i32, %c0_i32_0 : i32, i32
  }
  func.func @transform_3(%arg0: i32, %arg1: i32) -> (i32, i32) {
    %c0_i32 = arith.constant 0 : i32
    %c0_i32_0 = arith.constant 0 : i32
    return %c0_i32, %arg1 : i32, i32
  }
  func.func @transform_4(%arg0: i32, %arg1: i32) -> (i32, i32) {
    %c0_i32 = arith.constant 0 : i32
    %c0_i32_0 = arith.constant 0 : i32
    return %c0_i32, %arg1 : i32, i32
  }
  func.func @transform_5(%arg0: i32, %arg1: i32) -> (i32, i32) {
    %c0_i32 = arith.constant 0 : i32
    return %arg0, %arg1 : i32, i32
  }
}

module attributes {stable_mosaic.version = 11 : i64} {
  func.func @attn_self_kernel(%arg0: i32, %arg1: memref<1x8x96xf32, #tpu.memory_space<vmem>>, %arg2: memref<1x8x8xi32, #tpu.memory_space<vmem>>, %arg3: memref<1x8x32xf32, #tpu.memory_space<vmem>>) attributes {dimension_semantics = [#tpu.dimension_semantics<parallel>], iteration_bounds = array<i64: 2>, scalar_prefetch = 0 : i64, scratch_operands = 0 : i64, tpu.core_type = #tpu.core_type<tc>, window_params = [{transform_indices = @transform_0, window_bounds = array<i64: 1, 8, 96>}, {pipeline_mode = #tpu.pipeline_mode<synchronous>, transform_indices = @transform_1, window_bounds = array<i64: 1, 8, 8>}, {transform_indices = @transform_2, window_bounds = array<i64: 1, 8, 32>}]} {
    %c0 = arith.constant 0 : index
    %c0_0 = arith.constant 0 : index
    %c0_1 = arith.constant 0 : index
    %0 = vector.load %arg1[%c0, %c0_0, %c0_1] : memref<1x8x96xf32, #tpu.memory_space<vmem>>, vector<1x8x96xf32>
    %1 = vector.shape_cast %0 : vector<1x8x96xf32> to vector<8x96xf32>
    %2 = vector.extract_strided_slice %1 {offsets = [0, 0], sizes = [8, 32], strides = [1, 1]} : vector<8x96xf32> to vector<8x32xf32>
    %3 = vector.extract_strided_slice %1 {offsets = [0, 32], sizes = [8, 32], strides = [1, 1]} : vector<8x96xf32> to vector<8x32xf32>
    %4 = vector.extract_strided_slice %1 {offsets = [0, 64], sizes = [8, 32], strides = [1, 1]} : vector<8x96xf32> to vector<8x32xf32>
    %c0_2 = arith.constant 0 : index
    %c0_3 = arith.constant 0 : index
    %c0_4 = arith.constant 0 : index
    %5 = vector.load %arg2[%c0_2, %c0_3, %c0_4] : memref<1x8x8xi32, #tpu.memory_space<vmem>>, vector<1x8x8xi32>
    %6 = vector.shape_cast %5 : vector<1x8x8xi32> to vector<8x8xi32>
    %7 = vector.extract_strided_slice %2 {offsets = [0, 0], sizes = [8, 8], strides = [1, 1]} : vector<8x32xf32> to vector<8x8xf32>
    %8 = vector.extract_strided_slice %3 {offsets = [0, 0], sizes = [8, 8], strides = [1, 1]} : vector<8x32xf32> to vector<8x8xf32>
    %9 = vector.extract_strided_slice %4 {offsets = [0, 0], sizes = [8, 8], strides = [1, 1]} : vector<8x32xf32> to vector<8x8xf32>
    %cst = arith.constant dense<0.000000e+00> : vector<8x8xf32>
    %10 = tpu.matmul %7, %8, %cst {dimension_numbers = #tpu.dot_dimension_numbers<[1], [1], [0], [0], [0, 0, 1, 0], [], []>} : vector<8x8xf32>, vector<8x8xf32>, vector<8x8xf32> -> vector<8x8xf32>
    %cst_5 = arith.constant 0.353553385 : f32
    %11 = vector.broadcast %cst_5 : f32 to vector<8x8xf32>
    %12 = arith.mulf %10, %11 : vector<8x8xf32>
    %c0_i32 = arith.constant 0 : i32
    %13 = vector.broadcast %c0_i32 : i32 to vector<8x8xi32>
    %14 = arith.cmpi eq, %6, %13 : vector<8x8xi32>
    %cst_6 = arith.constant -1.000000e+09 : f32
    %15 = vector.broadcast %cst_6 : f32 to vector<8x8xf32>
    %16 = arith.select %14, %15, %12 : vector<8x8xi1>, vector<8x8xf32>
    %cst_7 = arith.constant dense<0xFF800000> : vector<8xf32>
    %17 = vector.multi_reduction <maximumf>, %16, %cst_7 [1] : vector<8x8xf32> to vector<8xf32>
    %18 = vector.shape_cast %17 : vector<8xf32> to vector<8x1xf32>
    %19 = vector.broadcast %18 : vector<8x1xf32> to vector<8x8xf32>
    %20 = arith.subf %16, %19 : vector<8x8xf32>
    %21 = math.exp %20 : vector<8x8xf32>
    %cst_8 = arith.constant dense<0.000000e+00> : vector<8xf32>
    %22 = vector.multi_reduction <add>, %21, %cst_8 [1] : vector<8x8xf32> to vector<8xf32>
    %23 = vector.shape_cast %22 : vector<8xf32> to vector<8x1xf32>
    %24 = tpu.reciprocal %23 {approx = true} : vector<8x1xf32> -> vector<8x1xf32>
    %25 = vector.broadcast %24 : vector<8x1xf32> to vector<8x8xf32>
    %26 = arith.mulf %21, %25 : vector<8x8xf32>
    %cst_9 = arith.constant dense<0.000000e+00> : vector<8x8xf32>
    %27 = tpu.matmul %26, %9, %cst_9 {dimension_numbers = #tpu.dot_dimension_numbers<[1], [0], [0], [1], [0, 0, 1, 1], [], []>} : vector<8x8xf32>, vector<8x8xf32>, vector<8x8xf32> -> vector<8x8xf32>
    %28 = vector.extract_strided_slice %2 {offsets = [0, 8], sizes = [8, 8], strides = [1, 1]} : vector<8x32xf32> to vector<8x8xf32>
    %29 = vector.extract_strided_slice %3 {offsets = [0, 8], sizes = [8, 8], strides = [1, 1]} : vector<8x32xf32> to vector<8x8xf32>
    %30 = vector.extract_strided_slice %4 {offsets = [0, 8], sizes = [8, 8], strides = [1, 1]} : vector<8x32xf32> to vector<8x8xf32>
    %cst_10 = arith.constant dense<0.000000e+00> : vector<8x8xf32>
    %31 = tpu.matmul %28, %29, %cst_10 {dimension_numbers = #tpu.dot_dimension_numbers<[1], [1], [0], [0], [0, 0, 1, 0], [], []>} : vector<8x8xf32>, vector<8x8xf32>, vector<8x8xf32> -> vector<8x8xf32>
    %cst_11 = arith.constant 0.353553385 : f32
    %32 = vector.broadcast %cst_11 : f32 to vector<8x8xf32>
    %33 = arith.mulf %31, %32 : vector<8x8xf32>
    %c0_i32_12 = arith.constant 0 : i32
    %34 = vector.broadcast %c0_i32_12 : i32 to vector<8x8xi32>
    %35 = arith.cmpi eq, %6, %34 : vector<8x8xi32>
    %cst_13 = arith.constant -1.000000e+09 : f32
    %36 = vector.broadcast %cst_13 : f32 to vector<8x8xf32>
    %37 = arith.select %35, %36, %33 : vector<8x8xi1>, vector<8x8xf32>
    %cst_14 = arith.constant dense<0xFF800000> : vector<8xf32>
    %38 = vector.multi_reduction <maximumf>, %37, %cst_14 [1] : vector<8x8xf32> to vector<8xf32>
    %39 = vector.shape_cast %38 : vector<8xf32> to vector<8x1xf32>
    %40 = vector.broadcast %39 : vector<8x1xf32> to vector<8x8xf32>
    %41 = arith.subf %37, %40 : vector<8x8xf32>
    %42 = math.exp %41 : vector<8x8xf32>
    %cst_15 = arith.constant dense<0.000000e+00> : vector<8xf32>
    %43 = vector.multi_reduction <add>, %42, %cst_15 [1] : vector<8x8xf32> to vector<8xf32>
    %44 = vector.shape_cast %43 : vector<8xf32> to vector<8x1xf32>
    %45 = tpu.reciprocal %44 {approx = true} : vector<8x1xf32> -> vector<8x1xf32>
    %46 = vector.broadcast %45 : vector<8x1xf32> to vector<8x8xf32>
    %47 = arith.mulf %42, %46 : vector<8x8xf32>
    %cst_16 = arith.constant dense<0.000000e+00> : vector<8x8xf32>
    %48 = tpu.matmul %47, %30, %cst_16 {dimension_numbers = #tpu.dot_dimension_numbers<[1], [0], [0], [1], [0, 0, 1, 1], [], []>} : vector<8x8xf32>, vector<8x8xf32>, vector<8x8xf32> -> vector<8x8xf32>
    %49 = vector.extract_strided_slice %2 {offsets = [0, 16], sizes = [8, 8], strides = [1, 1]} : vector<8x32xf32> to vector<8x8xf32>
    %50 = vector.extract_strided_slice %3 {offsets = [0, 16], sizes = [8, 8], strides = [1, 1]} : vector<8x32xf32> to vector<8x8xf32>
    %51 = vector.extract_strided_slice %4 {offsets = [0, 16], sizes = [8, 8], strides = [1, 1]} : vector<8x32xf32> to vector<8x8xf32>
    %cst_17 = arith.constant dense<0.000000e+00> : vector<8x8xf32>
    %52 = tpu.matmul %49, %50, %cst_17 {dimension_numbers = #tpu.dot_dimension_numbers<[1], [1], [0], [0], [0, 0, 1, 0], [], []>} : vector<8x8xf32>, vector<8x8xf32>, vector<8x8xf32> -> vector<8x8xf32>
    %cst_18 = arith.constant 0.353553385 : f32
    %53 = vector.broadcast %cst_18 : f32 to vector<8x8xf32>
    %54 = arith.mulf %52, %53 : vector<8x8xf32>
    %c0_i32_19 = arith.constant 0 : i32
    %55 = vector.broadcast %c0_i32_19 : i32 to vector<8x8xi32>
    %56 = arith.cmpi eq, %6, %55 : vector<8x8xi32>
    %cst_20 = arith.constant -1.000000e+09 : f32
    %57 = vector.broadcast %cst_20 : f32 to vector<8x8xf32>
    %58 = arith.select %56, %57, %54 : vector<8x8xi1>, vector<8x8xf32>
    %cst_21 = arith.constant dense<0xFF800000> : vector<8xf32>
    %59 = vector.multi_reduction <maximumf>, %58, %cst_21 [1] : vector<8x8xf32> to vector<8xf32>
    %60 = vector.shape_cast %59 : vector<8xf32> to vector<8x1xf32>
    %61 = vector.broadcast %60 : vector<8x1xf32> to vector<8x8xf32>
    %62 = arith.subf %58, %61 : vector<8x8xf32>
    %63 = math.exp %62 : vector<8x8xf32>
    %cst_22 = arith.constant dense<0.000000e+00> : vector<8xf32>
    %64 = vector.multi_reduction <add>, %63, %cst_22 [1] : vector<8x8xf32> to vector<8xf32>
    %65 = vector.shape_cast %64 : vector<8xf32> to vector<8x1xf32>
    %66 = tpu.reciprocal %65 {approx = true} : vector<8x1xf32> -> vector<8x1xf32>
    %67 = vector.broadcast %66 : vector<8x1xf32> to vector<8x8xf32>
    %68 = arith.mulf %63, %67 : vector<8x8xf32>
    %cst_23 = arith.constant dense<0.000000e+00> : vector<8x8xf32>
    %69 = tpu.matmul %68, %51, %cst_23 {dimension_numbers = #tpu.dot_dimension_numbers<[1], [0], [0], [1], [0, 0, 1, 1], [], []>} : vector<8x8xf32>, vector<8x8xf32>, vector<8x8xf32> -> vector<8x8xf32>
    %70 = vector.extract_strided_slice %2 {offsets = [0, 24], sizes = [8, 8], strides = [1, 1]} : vector<8x32xf32> to vector<8x8xf32>
    %71 = vector.extract_strided_slice %3 {offsets = [0, 24], sizes = [8, 8], strides = [1, 1]} : vector<8x32xf32> to vector<8x8xf32>
    %72 = vector.extract_strided_slice %4 {offsets = [0, 24], sizes = [8, 8], strides = [1, 1]} : vector<8x32xf32> to vector<8x8xf32>
    %cst_24 = arith.constant dense<0.000000e+00> : vector<8x8xf32>
    %73 = tpu.matmul %70, %71, %cst_24 {dimension_numbers = #tpu.dot_dimension_numbers<[1], [1], [0], [0], [0, 0, 1, 0], [], []>} : vector<8x8xf32>, vector<8x8xf32>, vector<8x8xf32> -> vector<8x8xf32>
    %cst_25 = arith.constant 0.353553385 : f32
    %74 = vector.broadcast %cst_25 : f32 to vector<8x8xf32>
    %75 = arith.mulf %73, %74 : vector<8x8xf32>
    %c0_i32_26 = arith.constant 0 : i32
    %76 = vector.broadcast %c0_i32_26 : i32 to vector<8x8xi32>
    %77 = arith.cmpi eq, %6, %76 : vector<8x8xi32>
    %cst_27 = arith.constant -1.000000e+09 : f32
    %78 = vector.broadcast %cst_27 : f32 to vector<8x8xf32>
    %79 = arith.select %77, %78, %75 : vector<8x8xi1>, vector<8x8xf32>
    %cst_28 = arith.constant dense<0xFF800000> : vector<8xf32>
    %80 = vector.multi_reduction <maximumf>, %79, %cst_28 [1] : vector<8x8xf32> to vector<8xf32>
    %81 = vector.shape_cast %80 : vector<8xf32> to vector<8x1xf32>
    %82 = vector.broadcast %81 : vector<8x1xf32> to vector<8x8xf32>
    %83 = arith.subf %79, %82 : vector<8x8xf32>
    %84 = math.exp %83 : vector<8x8xf32>
    %cst_29 = arith.constant dense<0.000000e+00> : vector<8xf32>
    %85 = vector.multi_reduction <add>, %84, %cst_29 [1] : vector<8x8xf32> to vector<8xf32>
    %86 = vector.shape_cast %85 : vector<8xf32> to vector<8x1xf32>
    %87 = tpu.reciprocal %86 {approx = true} : vector<8x1xf32> -> vector<8x1xf32>
    %88 = vector.broadcast %87 : vector<8x1xf32> to vector<8x8xf32>
    %89 = arith.mulf %84, %88 : vector<8x8xf32>
    %cst_30 = arith.constant dense<0.000000e+00> : vector<8x8xf32>
    %90 = tpu.matmul %89, %72, %cst_30 {dimension_numbers = #tpu.dot_dimension_numbers<[1], [0], [0], [1], [0, 0, 1, 1], [], []>} : vector<8x8xf32>, vector<8x8xf32>, vector<8x8xf32> -> vector<8x8xf32>
    %91 = tpu.concatenate %27, %48, %69, %90 in 1 : vector<8x8xf32>, vector<8x8xf32>, vector<8x8xf32>, vector<8x8xf32> -> vector<8x32xf32>
    %c0_31 = arith.constant 0 : index
    %c0_32 = arith.constant 0 : index
    %c0_33 = arith.constant 0 : index
    %92 = vector.load %arg3[%c0_31, %c0_32, %c0_33] : memref<1x8x32xf32, #tpu.memory_space<vmem>>, vector<1x8x32xf32>
    %93 = vector.shape_cast %92 : vector<1x8x32xf32> to vector<8x32xf32>
    %94 = vector.shape_cast %91 : vector<8x32xf32> to vector<1x8x32xf32>
    tpu.vector_store %arg3[%c0_31, %c0_32, %c0_33], %94 {strides = array<i32>} : memref<1x8x32xf32, #tpu.memory_space<vmem>>, vector<1x8x32xf32>,
    return
  }
  func.func @transform_0(%arg0: i32) -> (i32, i32, i32) {
    %c0_i32 = arith.constant 0 : i32
    %c0_i32_0 = arith.constant 0 : i32
    %c0_i32_1 = arith.constant 0 : i32
    return %arg0, %c0_i32, %c0_i32_0 : i32, i32, i32
  }
  func.func @transform_1(%arg0: i32) -> (i32, i32, i32) {
    %c0_i32 = arith.constant 0 : i32
    %c0_i32_0 = arith.constant 0 : i32
    %c0_i32_1 = arith.constant 0 : i32
    %c0_i32_2 = arith.constant 0 : i32
    return %c0_i32, %c0_i32_0, %c0_i32_1 : i32, i32, i32
  }
  func.func @transform_2(%arg0: i32) -> (i32, i32, i32) {
    %c0_i32 = arith.constant 0 : i32
    %c0_i32_0 = arith.constant 0 : i32
    %c0_i32_1 = arith.constant 0 : i32
    return %arg0, %c0_i32, %c0_i32_0 : i32, i32, i32
  }
}

module attributes {stable_mosaic.version = 11 : i64} {
  func.func @ln_linear_kernel(%arg0: i32, %arg1: i32, %arg2: memref<16x32xf32, #tpu.memory_space<vmem>>, %arg3: memref<1x32xf32, #tpu.memory_space<vmem>>, %arg4: memref<1x32xf32, #tpu.memory_space<vmem>>, %arg5: memref<32x96xf32, #tpu.memory_space<vmem>>, %arg6: memref<1x96xf32, #tpu.memory_space<vmem>>, %arg7: memref<16x96xf32, #tpu.memory_space<vmem>>) attributes {dimension_semantics = [#tpu.dimension_semantics<parallel>, #tpu.dimension_semantics<parallel>], iteration_bounds = array<i64: 1, 1>, scalar_prefetch = 0 : i64, scratch_operands = 0 : i64, tpu.core_type = #tpu.core_type<tc>, window_params = [{transform_indices = @transform_0, window_bounds = array<i64: 16, 32>}, {pipeline_mode = #tpu.pipeline_mode<synchronous>, transform_indices = @transform_1, window_bounds = array<i64: 1, 32>}, {pipeline_mode = #tpu.pipeline_mode<synchronous>, transform_indices = @transform_2, window_bounds = array<i64: 1, 32>}, {transform_indices = @transform_3, window_bounds = array<i64: 32, 96>}, {transform_indices = @transform_4, window_bounds = array<i64: 1, 96>}, {transform_indices = @transform_5, window_bounds = array<i64: 16, 96>}]} {
    %c0 = arith.constant 0 : index
    %c0_0 = arith.constant 0 : index
    %0 = vector.load %arg2[%c0, %c0_0] : memref<16x32xf32, #tpu.memory_space<vmem>>, vector<16x32xf32>
    %cst = arith.constant dense<0.000000e+00> : vector<16xf32>
    %1 = vector.multi_reduction <add>, %0, %cst [1] : vector<16x32xf32> to vector<16xf32>
    %2 = vector.shape_cast %1 : vector<16xf32> to vector<16x1xf32>
    %cst_1 = arith.constant 3.200000e+01 : f32
    %3 = vector.broadcast %cst_1 : f32 to vector<16x1xf32>
    %4 = arith.divf %2, %3 : vector<16x1xf32>
    %5 = vector.broadcast %4 : vector<16x1xf32> to vector<16x32xf32>
    %6 = arith.subf %0, %5 : vector<16x32xf32>
    %7 = arith.mulf %6, %6 : vector<16x32xf32>
    %cst_2 = arith.constant dense<0.000000e+00> : vector<16xf32>
    %8 = vector.multi_reduction <add>, %7, %cst_2 [1] : vector<16x32xf32> to vector<16xf32>
    %9 = vector.shape_cast %8 : vector<16xf32> to vector<16x1xf32>
    %cst_3 = arith.constant 3.100000e+01 : f32
    %10 = vector.broadcast %cst_3 : f32 to vector<16x1xf32>
    %11 = arith.divf %9, %10 : vector<16x1xf32>
    %12 = math.sqrt %11 : vector<16x1xf32>
    %c0_4 = arith.constant 0 : index
    %c0_5 = arith.constant 0 : index
    %13 = vector.load %arg3[%c0_4, %c0_5] : memref<1x32xf32, #tpu.memory_space<vmem>>, vector<1x32xf32>
    %14 = vector.broadcast %4 : vector<16x1xf32> to vector<16x32xf32>
    %15 = arith.subf %0, %14 : vector<16x32xf32>
    %16 = vector.broadcast %13 : vector<1x32xf32> to vector<16x32xf32>
    %17 = arith.mulf %16, %15 : vector<16x32xf32>
    %cst_6 = arith.constant 9.99999997E-7 : f32
    %18 = vector.broadcast %cst_6 : f32 to vector<16x1xf32>
    %19 = arith.addf %12, %18 : vector<16x1xf32>
    %20 = vector.broadcast %19 : vector<16x1xf32> to vector<16x32xf32>
    %21 = arith.divf %17, %20 : vector<16x32xf32>
    %c0_7 = arith.constant 0 : index
    %c0_8 = arith.constant 0 : index
    %22 = vector.load %arg4[%c0_7, %c0_8] : memref<1x32xf32, #tpu.memory_space<vmem>>, vector<1x32xf32>
    %23 = vector.broadcast %22 : vector<1x32xf32> to vector<16x32xf32>
    %24 = arith.addf %21, %23 : vector<16x32xf32>
    %c0_9 = arith.constant 0 : index
    %c0_10 = arith.constant 0 : index
    %25 = vector.load %arg5[%c0_9, %c0_10] : memref<32x96xf32, #tpu.memory_space<vmem>>, vector<32x96xf32>
    %cst_11 = arith.constant dense<0.000000e+00> : vector<16x96xf32>
    %26 = tpu.matmul %24, %25, %cst_11 {dimension_numbers = #tpu.dot_dimension_numbers<[1], [0], [0], [1], [0, 0, 1, 1], [], []>} : vector<16x32xf32>, vector<32x96xf32>, vector<16x96xf32> -> vector<16x96xf32>
    %c0_12 = arith.constant 0 : index
    %c0_13 = arith.constant 0 : index
    %27 = vector.load %arg6[%c0_12, %c0_13] : memref<1x96xf32, #tpu.memory_space<vmem>>, vector<1x96xf32>
    %28 = vector.broadcast %27 : vector<1x96xf32> to vector<16x96xf32>
    %29 = arith.addf %26, %28 : vector<16x96xf32>
    %c0_14 = arith.constant 0 : index
    %c0_15 = arith.constant 0 : index
    %30 = vector.load %arg7[%c0_14, %c0_15] : memref<16x96xf32, #tpu.memory_space<vmem>>, vector<16x96xf32>
    tpu.vector_store %arg7[%c0_14, %c0_15], %29 {strides = array<i32>} : memref<16x96xf32, #tpu.memory_space<vmem>>, vector<16x96xf32>,
    return
  }
  func.func @transform_0(%arg0: i32, %arg1: i32) -> (i32, i32) {
    %c0_i32 = arith.constant 0 : i32
    %c0_i32_0 = arith.constant 0 : i32
    return %arg0, %c0_i32 : i32, i32
  }
  func.func @transform_1(%arg0: i32, %arg1: i32) -> (i32, i32) {
    %c0_i32 = arith.constant 0 : i32
    %c0_i32_0 = arith.constant 0 : i32
    %c0_i32_1 = arith.constant 0 : i32
    return %c0_i32, %c0_i32_0 : i32, i32
  }
  func.func @transform_2(%arg0: i32, %arg1: i32) -> (i32, i32) {
    %c0_i32 = arith.constant 0 : i32
    %c0_i32_0 = arith.constant 0 : i32
    %c0_i32_1 = arith.constant 0 : i32
    return %c0_i32, %c0_i32_0 : i32, i32
  }
  func.func @transform_3(%arg0: i32, %arg1: i32) -> (i32, i32) {
    %c0_i32 = arith.constant 0 : i32
    %c0_i32_0 = arith.constant 0 : i32
    return %c0_i32, %arg1 : i32, i32
  }
  func.func @transform_4(%arg0: i32, %arg1: i32) -> (i32, i32) {
    %c0_i32 = arith.constant 0 : i32
    %c0_i32_0 = arith.constant 0 : i32
    return %c0_i32, %arg1 : i32, i32
  }
  func.func @transform_5(%arg0: i32, %arg1: i32) -> (i32, i32) {
    %c0_i32 = arith.constant 0 : i32
    return %arg0, %arg1 : i32, i32
  }
}

module attributes {stable_mosaic.version = 11 : i64} {
  func.func @linear_kernel(%arg0: i32, %arg1: i32, %arg2: i32, %arg3: memref<16x32xf32, #tpu.memory_space<vmem>>, %arg4: memref<32x64xf32, #tpu.memory_space<vmem>>, %arg5: memref<1x64xf32, #tpu.memory_space<vmem>>, %arg6: memref<16x64xf32, #tpu.memory_space<vmem>>, %arg7: memref<16x64xf32, #tpu.memory_space<vmem>>) attributes {dimension_semantics = [#tpu.dimension_semantics<parallel>, #tpu.dimension_semantics<parallel>, #tpu.dimension_semantics<arbitrary>], iteration_bounds = array<i64: 1, 1, 1>, scalar_prefetch = 0 : i64, scratch_operands = 1 : i64, tpu.core_type = #tpu.core_type<tc>, window_params = [{transform_indices = @transform_0, window_bounds = array<i64: 16, 32>}, {transform_indices = @transform_1, window_bounds = array<i64: 32, 64>}, {transform_indices = @transform_2, window_bounds = array<i64: 1, 64>}, {transform_indices = @transform_3, window_bounds = array<i64: 16, 64>}]} {
    %c0_i32 = arith.constant 0 : i32
    %0 = arith.cmpi eq, %arg2, %c0_i32 : i32
    %1 = arith.extui %0 : i1 to i32
    %c0_i32_0 = arith.constant 0 : i32
    %2 = arith.cmpi ne, %1, %c0_i32_0 : i32
    scf.if %2 {
      %cst_10 = arith.constant 0.000000e+00 : f32
      %12 = vector.broadcast %cst_10 : f32 to vector<16x64xf32>
      %c0_11 = arith.constant 0 : index
      %c0_12 = arith.constant 0 : index
      %13 = vector.load %arg7[%c0_11, %c0_12] : memref<16x64xf32, #tpu.memory_space<vmem>>, vector<16x64xf32>
      tpu.vector_store %arg7[%c0_11, %c0_12], %12 {strides = array<i32>} : memref<16x64xf32, #tpu.memory_space<vmem>>, vector<16x64xf32>,
    } else {
    }
    %c0 = arith.constant 0 : index
    %c0_1 = arith.constant 0 : index
    %3 = vector.load %arg7[%c0, %c0_1] : memref<16x64xf32, #tpu.memory_space<vmem>>, vector<16x64xf32>
    %c0_2 = arith.constant 0 : index
    %c0_3 = arith.constant 0 : index
    %4 = vector.load %arg3[%c0_2, %c0_3] : memref<16x32xf32, #tpu.memory_space<vmem>>, vector<16x32xf32>
    %c0_4 = arith.constant 0 : index
    %c0_5 = arith.constant 0 : index
    %5 = vector.load %arg4[%c0_4, %c0_5] : memref<32x64xf32, #tpu.memory_space<vmem>>, vector<32x64xf32>
    %cst = arith.constant dense<0.000000e+00> : vector<16x64xf32>
    %6 = tpu.matmul %4, %5, %cst {dimension_numbers = #tpu.dot_dimension_numbers<[1], [0], [0], [1], [0, 0, 1, 1], [], []>} : vector<16x32xf32>, vector<32x64xf32>, vector<16x64xf32> -> vector<16x64xf32>
    %7 = arith.addf %3, %6 : vector<16x64xf32>
    %c0_6 = arith.constant 0 : index
    %c0_7 = arith.constant 0 : index
    %8 = vector.load %arg7[%c0_6, %c0_7] : memref<16x64xf32, #tpu.memory_space<vmem>>, vector<16x64xf32>
    tpu.vector_store %arg7[%c0_6, %c0_7], %7 {strides = array<i32>} : memref<16x64xf32, #tpu.memory_space<vmem>>, vector<16x64xf32>,
    %c0_i32_8 = arith.constant 0 : i32
    %9 = arith.cmpi eq, %arg2, %c0_i32_8 : i32
    %10 = arith.extui %9 : i1 to i32
    %c0_i32_9 = arith.constant 0 : i32
    %11 = arith.cmpi ne, %10, %c0_i32_9 : i32
    scf.if %11 {
      %c0_10 = arith.constant 0 : index
      %c0_11 = arith.constant 0 : index
      %12 = vector.load %arg7[%c0_10, %c0_11] : memref<16x64xf32, #tpu.memory_space<vmem>>, vector<16x64xf32>
      %c0_12 = arith.constant 0 : index
      %c0_13 = arith.constant 0 : index
      %13 = vector.load %arg5[%c0_12, %c0_13] : memref<1x64xf32, #tpu.memory_space<vmem>>, vector<1x64xf32>
      %14 = vector.broadcast %13 : vector<1x64xf32> to vector<16x64xf32>
      %15 = arith.addf %12, %14 : vector<16x64xf32>
      %c0_14 = arith.constant 0 : index
      %c0_15 = arith.constant 0 : index
      %16 = vector.load %arg6[%c0_14, %c0_15] : memref<16x64xf32, #tpu.memory_space<vmem>>, vector<16x64xf32>
      tpu.vector_store %arg6[%c0_14, %c0_15], %15 {strides = array<i32>} : memref<16x64xf32, #tpu.memory_space<vmem>>, vector<16x64xf32>,
    } else {
    }
    return
  }
  func.func @transform_0(%arg0: i32, %arg1: i32, %arg2: i32) -> (i32, i32) {
    %c0_i32 = arith.constant 0 : i32
    return %arg0, %arg2 : i32, i32
  }
  func.func @transform_1(%arg0: i32, %arg1: i32, %arg2: i32) -> (i32, i32) {
    %c0_i32 = arith.constant 0 : i32
    return %arg2, %arg1 : i32, i32
  }
  func.func @transform_2(%arg0: i32, %arg1: i32, %arg2: i32) -> (i32, i32) {
    %c0_i32 = arith.constant 0 : i32
    %c0_i32_0 = arith.constant 0 : i32
    return %c0_i32, %arg1 : i32, i32
  }
  func.func @transform_3(%arg0: i32, %arg1: i32, %arg2: i32) -> (i32, i32) {
    %c0_i32 = arith.constant 0 : i32
    return %arg0, %arg1 : i32, i32
  }
}

module attributes {stable_mosaic.version = 11 : i64} {
  func.func @ln_linear_kernel(%arg0: i32, %arg1: i32, %arg2: memref<16x32xf32, #tpu.memory_space<vmem>>, %arg3: memref<1x32xf32, #tpu.memory_space<vmem>>, %arg4: memref<1x32xf32, #tpu.memory_space<vmem>>, %arg5: memref<32x64xf32, #tpu.memory_space<vmem>>, %arg6: memref<1x64xf32, #tpu.memory_space<vmem>>, %arg7: memref<16x64xf32, #tpu.memory_space<vmem>>) attributes {dimension_semantics = [#tpu.dimension_semantics<parallel>, #tpu.dimension_semantics<parallel>], iteration_bounds = array<i64: 1, 1>, scalar_prefetch = 0 : i64, scratch_operands = 0 : i64, tpu.core_type = #tpu.core_type<tc>, window_params = [{transform_indices = @transform_0, window_bounds = array<i64: 16, 32>}, {pipeline_mode = #tpu.pipeline_mode<synchronous>, transform_indices = @transform_1, window_bounds = array<i64: 1, 32>}, {pipeline_mode = #tpu.pipeline_mode<synchronous>, transform_indices = @transform_2, window_bounds = array<i64: 1, 32>}, {transform_indices = @transform_3, window_bounds = array<i64: 32, 64>}, {transform_indices = @transform_4, window_bounds = array<i64: 1, 64>}, {transform_indices = @transform_5, window_bounds = array<i64: 16, 64>}]} {
    %c0 = arith.constant 0 : index
    %c0_0 = arith.constant 0 : index
    %0 = vector.load %arg2[%c0, %c0_0] : memref<16x32xf32, #tpu.memory_space<vmem>>, vector<16x32xf32>
    %cst = arith.constant dense<0.000000e+00> : vector<16xf32>
    %1 = vector.multi_reduction <add>, %0, %cst [1] : vector<16x32xf32> to vector<16xf32>
    %2 = vector.shape_cast %1 : vector<16xf32> to vector<16x1xf32>
    %cst_1 = arith.constant 3.200000e+01 : f32
    %3 = vector.broadcast %cst_1 : f32 to vector<16x1xf32>
    %4 = arith.divf %2, %3 : vector<16x1xf32>
    %5 = vector.broadcast %4 : vector<16x1xf32> to vector<16x32xf32>
    %6 = arith.subf %0, %5 : vector<16x32xf32>
    %7 = arith.mulf %6, %6 : vector<16x32xf32>
    %cst_2 = arith.constant dense<0.000000e+00> : vector<16xf32>
    %8 = vector.multi_reduction <add>, %7, %cst_2 [1] : vector<16x32xf32> to vector<16xf32>
    %9 = vector.shape_cast %8 : vector<16xf32> to vector<16x1xf32>
    %cst_3 = arith.constant 3.100000e+01 : f32
    %10 = vector.broadcast %cst_3 : f32 to vector<16x1xf32>
    %11 = arith.divf %9, %10 : vector<16x1xf32>
    %12 = math.sqrt %11 : vector<16x1xf32>
    %c0_4 = arith.constant 0 : index
    %c0_5 = arith.constant 0 : index
    %13 = vector.load %arg3[%c0_4, %c0_5] : memref<1x32xf32, #tpu.memory_space<vmem>>, vector<1x32xf32>
    %14 = vector.broadcast %4 : vector<16x1xf32> to vector<16x32xf32>
    %15 = arith.subf %0, %14 : vector<16x32xf32>
    %16 = vector.broadcast %13 : vector<1x32xf32> to vector<16x32xf32>
    %17 = arith.mulf %16, %15 : vector<16x32xf32>
    %cst_6 = arith.constant 9.99999997E-7 : f32
    %18 = vector.broadcast %cst_6 : f32 to vector<16x1xf32>
    %19 = arith.addf %12, %18 : vector<16x1xf32>
    %20 = vector.broadcast %19 : vector<16x1xf32> to vector<16x32xf32>
    %21 = arith.divf %17, %20 : vector<16x32xf32>
    %c0_7 = arith.constant 0 : index
    %c0_8 = arith.constant 0 : index
    %22 = vector.load %arg4[%c0_7, %c0_8] : memref<1x32xf32, #tpu.memory_space<vmem>>, vector<1x32xf32>
    %23 = vector.broadcast %22 : vector<1x32xf32> to vector<16x32xf32>
    %24 = arith.addf %21, %23 : vector<16x32xf32>
    %c0_9 = arith.constant 0 : index
    %c0_10 = arith.constant 0 : index
    %25 = vector.load %arg5[%c0_9, %c0_10] : memref<32x64xf32, #tpu.memory_space<vmem>>, vector<32x64xf32>
    %cst_11 = arith.constant dense<0.000000e+00> : vector<16x64xf32>
    %26 = tpu.matmul %24, %25, %cst_11 {dimension_numbers = #tpu.dot_dimension_numbers<[1], [0], [0], [1], [0, 0, 1, 1], [], []>} : vector<16x32xf32>, vector<32x64xf32>, vector<16x64xf32> -> vector<16x64xf32>
    %c0_12 = arith.constant 0 : index
    %c0_13 = arith.constant 0 : index
    %27 = vector.load %arg6[%c0_12, %c0_13] : memref<1x64xf32, #tpu.memory_space<vmem>>, vector<1x64xf32>
    %28 = vector.broadcast %27 : vector<1x64xf32> to vector<16x64xf32>
    %29 = arith.addf %26, %28 : vector<16x64xf32>
    %cst_14 = arith.constant 0.000000e+00 : f32
    %30 = vector.broadcast %cst_14 : f32 to vector<16x64xf32>
    %31 = arith.maximumf %29, %30 : vector<16x64xf32>
    %c0_15 = arith.constant 0 : index
    %c0_16 = arith.constant 0 : index
    %32 = vector.load %arg7[%c0_15, %c0_16] : memref<16x64xf32, #tpu.memory_space<vmem>>, vector<16x64xf32>
    tpu.vector_store %arg7[%c0_15, %c0_16], %31 {strides = array<i32>} : memref<16x64xf32, #tpu.memory_space<vmem>>, vector<16x64xf32>,
    return
  }
  func.func @transform_0(%arg0: i32, %arg1: i32) -> (i32, i32) {
    %c0_i32 = arith.constant 0 : i32
    %c0_i32_0 = arith.constant 0 : i32
    return %arg0, %c0_i32 : i32, i32
  }
  func.func @transform_1(%arg0: i32, %arg1: i32) -> (i32, i32) {
    %c0_i32 = arith.constant 0 : i32
    %c0_i32_0 = arith.constant 0 : i32
    %c0_i32_1 = arith.constant 0 : i32
    return %c0_i32, %c0_i32_0 : i32, i32
  }
  func.func @transform_2(%arg0: i32, %arg1: i32) -> (i32, i32) {
    %c0_i32 = arith.constant 0 : i32
    %c0_i32_0 = arith.constant 0 : i32
    %c0_i32_1 = arith.constant 0 : i32
    return %c0_i32, %c0_i32_0 : i32, i32
  }
  func.func @transform_3(%arg0: i32, %arg1: i32) -> (i32, i32) {
    %c0_i32 = arith.constant 0 : i32
    %c0_i32_0 = arith.constant 0 : i32
    return %c0_i32, %arg1 : i32, i32
  }
  func.func @transform_4(%arg0: i32, %arg1: i32) -> (i32, i32) {
    %c0_i32 = arith.constant 0 : i32
    %c0_i32_0 = arith.constant 0 : i32
    return %c0_i32, %arg1 : i32, i32
  }
  func.func @transform_5(%arg0: i32, %arg1: i32) -> (i32, i32) {
    %c0_i32 = arith.constant 0 : i32
    return %arg0, %arg1 : i32, i32
  }
}

module attributes {stable_mosaic.version = 11 : i64} {
  func.func @attn_cross_kernel(%arg0: i32, %arg1: memref<1x8x32xf32, #tpu.memory_space<vmem>>, %arg2: memref<1x8x64xf32, #tpu.memory_space<vmem>>, %arg3: memref<1x1x8xi32, #tpu.memory_space<vmem>>, %arg4: memref<1x8x32xf32, #tpu.memory_space<vmem>>) attributes {dimension_semantics = [#tpu.dimension_semantics<parallel>], iteration_bounds = array<i64: 2>, scalar_prefetch = 0 : i64, scratch_operands = 0 : i64, tpu.core_type = #tpu.core_type<tc>, window_params = [{transform_indices = @transform_0, window_bounds = array<i64: 1, 8, 32>}, {transform_indices = @transform_1, window_bounds = array<i64: 1, 8, 64>}, {transform_indices = @transform_2, window_bounds = array<i64: 1, 1, 8>}, {transform_indices = @transform_3, window_bounds = array<i64: 1, 8, 32>}]} {
    %c0 = arith.constant 0 : index
    %c0_0 = arith.constant 0 : index
    %c0_1 = arith.constant 0 : index
    %0 = vector.load %arg1[%c0, %c0_0, %c0_1] : memref<1x8x32xf32, #tpu.memory_space<vmem>>, vector<1x8x32xf32>
    %1 = vector.shape_cast %0 : vector<1x8x32xf32> to vector<8x32xf32>
    %c0_2 = arith.constant 0 : index
    %c0_3 = arith.constant 0 : index
    %c0_4 = arith.constant 0 : index
    %2 = vector.load %arg2[%c0_2, %c0_3, %c0_4] : memref<1x8x64xf32, #tpu.memory_space<vmem>>, vector<1x8x64xf32>
    %3 = vector.shape_cast %2 : vector<1x8x64xf32> to vector<8x64xf32>
    %4 = vector.extract_strided_slice %3 {offsets = [0, 0], sizes = [8, 32], strides = [1, 1]} : vector<8x64xf32> to vector<8x32xf32>
    %5 = vector.extract_strided_slice %3 {offsets = [0, 32], sizes = [8, 32], strides = [1, 1]} : vector<8x64xf32> to vector<8x32xf32>
    %c0_5 = arith.constant 0 : index
    %c0_6 = arith.constant 0 : index
    %c0_7 = arith.constant 0 : index
    %6 = vector.load %arg3[%c0_5, %c0_6, %c0_7] : memref<1x1x8xi32, #tpu.memory_space<vmem>>, vector<1x1x8xi32>
    %7 = vector.shape_cast %6 : vector<1x1x8xi32> to vector<1x8xi32>
    %8 = vector.extract_strided_slice %1 {offsets = [0, 0], sizes = [8, 8], strides = [1, 1]} : vector<8x32xf32> to vector<8x8xf32>
    %9 = vector.extract_strided_slice %4 {offsets = [0, 0], sizes = [8, 8], strides = [1, 1]} : vector<8x32xf32> to vector<8x8xf32>
    %10 = vector.extract_strided_slice %5 {offsets = [0, 0], sizes = [8, 8], strides = [1, 1]} : vector<8x32xf32> to vector<8x8xf32>
    %cst = arith.constant dense<0.000000e+00> : vector<8x8xf32>
    %11 = tpu.matmul %8, %9, %cst {dimension_numbers = #tpu.dot_dimension_numbers<[1], [1], [0], [0], [0, 0, 1, 0], [], []>} : vector<8x8xf32>, vector<8x8xf32>, vector<8x8xf32> -> vector<8x8xf32>
    %cst_8 = arith.constant 0.353553385 : f32
    %12 = vector.broadcast %cst_8 : f32 to vector<8x8xf32>
    %13 = arith.mulf %11, %12 : vector<8x8xf32>
    %c0_i32 = arith.constant 0 : i32
    %14 = vector.broadcast %c0_i32 : i32 to vector<1x8xi32>
    %15 = arith.cmpi eq, %7, %14 : vector<1x8xi32>
    %cst_9 = arith.constant -1.000000e+09 : f32
    %16 = vector.shape_cast %15 : vector<1x8xi1> to vector<1x8xi1>
    %17 = vector.broadcast %16 : vector<1x8xi1> to vector<8x8xi1>
    %18 = vector.broadcast %cst_9 : f32 to vector<8x8xf32>
    %19 = arith.select %17, %18, %13 : vector<8x8xi1>, vector<8x8xf32>
    %cst_10 = arith.constant dense<0xFF800000> : vector<8xf32>
    %20 = vector.multi_reduction <maximumf>, %19, %cst_10 [1] : vector<8x8xf32> to vector<8xf32>
    %21 = vector.shape_cast %20 : vector<8xf32> to vector<8x1xf32>
    %22 = vector.broadcast %21 : vector<8x1xf32> to vector<8x8xf32>
    %23 = arith.subf %19, %22 : vector<8x8xf32>
    %24 = math.exp %23 : vector<8x8xf32>
    %cst_11 = arith.constant dense<0.000000e+00> : vector<8xf32>
    %25 = vector.multi_reduction <add>, %24, %cst_11 [1] : vector<8x8xf32> to vector<8xf32>
    %26 = vector.shape_cast %25 : vector<8xf32> to vector<8x1xf32>
    %27 = tpu.reciprocal %26 {approx = true} : vector<8x1xf32> -> vector<8x1xf32>
    %28 = vector.broadcast %27 : vector<8x1xf32> to vector<8x8xf32>
    %29 = arith.mulf %24, %28 : vector<8x8xf32>
    %cst_12 = arith.constant dense<0.000000e+00> : vector<8x8xf32>
    %30 = tpu.matmul %29, %10, %cst_12 {dimension_numbers = #tpu.dot_dimension_numbers<[1], [0], [0], [1], [0, 0, 1, 1], [], []>} : vector<8x8xf32>, vector<8x8xf32>, vector<8x8xf32> -> vector<8x8xf32>
    %31 = vector.extract_strided_slice %1 {offsets = [0, 8], sizes = [8, 8], strides = [1, 1]} : vector<8x32xf32> to vector<8x8xf32>
    %32 = vector.extract_strided_slice %4 {offsets = [0, 8], sizes = [8, 8], strides = [1, 1]} : vector<8x32xf32> to vector<8x8xf32>
    %33 = vector.extract_strided_slice %5 {offsets = [0, 8], sizes = [8, 8], strides = [1, 1]} : vector<8x32xf32> to vector<8x8xf32>
    %cst_13 = arith.constant dense<0.000000e+00> : vector<8x8xf32>
    %34 = tpu.matmul %31, %32, %cst_13 {dimension_numbers = #tpu.dot_dimension_numbers<[1], [1], [0], [0], [0, 0, 1, 0], [], []>} : vector<8x8xf32>, vector<8x8xf32>, vector<8x8xf32> -> vector<8x8xf32>
    %cst_14 = arith.constant 0.353553385 : f32
    %35 = vector.broadcast %cst_14 : f32 to vector<8x8xf32>
    %36 = arith.mulf %34, %35 : vector<8x8xf32>
    %c0_i32_15 = arith.constant 0 : i32
    %37 = vector.broadcast %c0_i32_15 : i32 to vector<1x8xi32>
    %38 = arith.cmpi eq, %7, %37 : vector<1x8xi32>
    %cst_16 = arith.constant -1.000000e+09 : f32
    %39 = vector.shape_cast %38 : vector<1x8xi1> to vector<1x8xi1>
    %40 = vector.broadcast %39 : vector<1x8xi1> to vector<8x8xi1>
    %41 = vector.broadcast %cst_16 : f32 to vector<8x8xf32>
    %42 = arith.select %40, %41, %36 : vector<8x8xi1>, vector<8x8xf32>
    %cst_17 = arith.constant dense<0xFF800000> : vector<8xf32>
    %43 = vector.multi_reduction <maximumf>, %42, %cst_17 [1] : vector<8x8xf32> to vector<8xf32>
    %44 = vector.shape_cast %43 : vector<8xf32> to vector<8x1xf32>
    %45 = vector.broadcast %44 : vector<8x1xf32> to vector<8x8xf32>
    %46 = arith.subf %42, %45 : vector<8x8xf32>
    %47 = math.exp %46 : vector<8x8xf32>
    %cst_18 = arith.constant dense<0.000000e+00> : vector<8xf32>
    %48 = vector.multi_reduction <add>, %47, %cst_18 [1] : vector<8x8xf32> to vector<8xf32>
    %49 = vector.shape_cast %48 : vector<8xf32> to vector<8x1xf32>
    %50 = tpu.reciprocal %49 {approx = true} : vector<8x1xf32> -> vector<8x1xf32>
    %51 = vector.broadcast %50 : vector<8x1xf32> to vector<8x8xf32>
    %52 = arith.mulf %47, %51 : vector<8x8xf32>
    %cst_19 = arith.constant dense<0.000000e+00> : vector<8x8xf32>
    %53 = tpu.matmul %52, %33, %cst_19 {dimension_numbers = #tpu.dot_dimension_numbers<[1], [0], [0], [1], [0, 0, 1, 1], [], []>} : vector<8x8xf32>, vector<8x8xf32>, vector<8x8xf32> -> vector<8x8xf32>
    %54 = vector.extract_strided_slice %1 {offsets = [0, 16], sizes = [8, 8], strides = [1, 1]} : vector<8x32xf32> to vector<8x8xf32>
    %55 = vector.extract_strided_slice %4 {offsets = [0, 16], sizes = [8, 8], strides = [1, 1]} : vector<8x32xf32> to vector<8x8xf32>
    %56 = vector.extract_strided_slice %5 {offsets = [0, 16], sizes = [8, 8], strides = [1, 1]} : vector<8x32xf32> to vector<8x8xf32>
    %cst_20 = arith.constant dense<0.000000e+00> : vector<8x8xf32>
    %57 = tpu.matmul %54, %55, %cst_20 {dimension_numbers = #tpu.dot_dimension_numbers<[1], [1], [0], [0], [0, 0, 1, 0], [], []>} : vector<8x8xf32>, vector<8x8xf32>, vector<8x8xf32> -> vector<8x8xf32>
    %cst_21 = arith.constant 0.353553385 : f32
    %58 = vector.broadcast %cst_21 : f32 to vector<8x8xf32>
    %59 = arith.mulf %57, %58 : vector<8x8xf32>
    %c0_i32_22 = arith.constant 0 : i32
    %60 = vector.broadcast %c0_i32_22 : i32 to vector<1x8xi32>
    %61 = arith.cmpi eq, %7, %60 : vector<1x8xi32>
    %cst_23 = arith.constant -1.000000e+09 : f32
    %62 = vector.shape_cast %61 : vector<1x8xi1> to vector<1x8xi1>
    %63 = vector.broadcast %62 : vector<1x8xi1> to vector<8x8xi1>
    %64 = vector.broadcast %cst_23 : f32 to vector<8x8xf32>
    %65 = arith.select %63, %64, %59 : vector<8x8xi1>, vector<8x8xf32>
    %cst_24 = arith.constant dense<0xFF800000> : vector<8xf32>
    %66 = vector.multi_reduction <maximumf>, %65, %cst_24 [1] : vector<8x8xf32> to vector<8xf32>
    %67 = vector.shape_cast %66 : vector<8xf32> to vector<8x1xf32>
    %68 = vector.broadcast %67 : vector<8x1xf32> to vector<8x8xf32>
    %69 = arith.subf %65, %68 : vector<8x8xf32>
    %70 = math.exp %69 : vector<8x8xf32>
    %cst_25 = arith.constant dense<0.000000e+00> : vector<8xf32>
    %71 = vector.multi_reduction <add>, %70, %cst_25 [1] : vector<8x8xf32> to vector<8xf32>
    %72 = vector.shape_cast %71 : vector<8xf32> to vector<8x1xf32>
    %73 = tpu.reciprocal %72 {approx = true} : vector<8x1xf32> -> vector<8x1xf32>
    %74 = vector.broadcast %73 : vector<8x1xf32> to vector<8x8xf32>
    %75 = arith.mulf %70, %74 : vector<8x8xf32>
    %cst_26 = arith.constant dense<0.000000e+00> : vector<8x8xf32>
    %76 = tpu.matmul %75, %56, %cst_26 {dimension_numbers = #tpu.dot_dimension_numbers<[1], [0], [0], [1], [0, 0, 1, 1], [], []>} : vector<8x8xf32>, vector<8x8xf32>, vector<8x8xf32> -> vector<8x8xf32>
    %77 = vector.extract_strided_slice %1 {offsets = [0, 24], sizes = [8, 8], strides = [1, 1]} : vector<8x32xf32> to vector<8x8xf32>
    %78 = vector.extract_strided_slice %4 {offsets = [0, 24], sizes = [8, 8], strides = [1, 1]} : vector<8x32xf32> to vector<8x8xf32>
    %79 = vector.extract_strided_slice %5 {offsets = [0, 24], sizes = [8, 8], strides = [1, 1]} : vector<8x32xf32> to vector<8x8xf32>
    %cst_27 = arith.constant dense<0.000000e+00> : vector<8x8xf32>
    %80 = tpu.matmul %77, %78, %cst_27 {dimension_numbers = #tpu.dot_dimension_numbers<[1], [1], [0], [0], [0, 0, 1, 0], [], []>} : vector<8x8xf32>, vector<8x8xf32>, vector<8x8xf32> -> vector<8x8xf32>
    %cst_28 = arith.constant 0.353553385 : f32
    %81 = vector.broadcast %cst_28 : f32 to vector<8x8xf32>
    %82 = arith.mulf %80, %81 : vector<8x8xf32>
    %c0_i32_29 = arith.constant 0 : i32
    %83 = vector.broadcast %c0_i32_29 : i32 to vector<1x8xi32>
    %84 = arith.cmpi eq, %7, %83 : vector<1x8xi32>
    %cst_30 = arith.constant -1.000000e+09 : f32
    %85 = vector.shape_cast %84 : vector<1x8xi1> to vector<1x8xi1>
    %86 = vector.broadcast %85 : vector<1x8xi1> to vector<8x8xi1>
    %87 = vector.broadcast %cst_30 : f32 to vector<8x8xf32>
    %88 = arith.select %86, %87, %82 : vector<8x8xi1>, vector<8x8xf32>
    %cst_31 = arith.constant dense<0xFF800000> : vector<8xf32>
    %89 = vector.multi_reduction <maximumf>, %88, %cst_31 [1] : vector<8x8xf32> to vector<8xf32>
    %90 = vector.shape_cast %89 : vector<8xf32> to vector<8x1xf32>
    %91 = vector.broadcast %90 : vector<8x1xf32> to vector<8x8xf32>
    %92 = arith.subf %88, %91 : vector<8x8xf32>
    %93 = math.exp %92 : vector<8x8xf32>
    %cst_32 = arith.constant dense<0.000000e+00> : vector<8xf32>
    %94 = vector.multi_reduction <add>, %93, %cst_32 [1] : vector<8x8xf32> to vector<8xf32>
    %95 = vector.shape_cast %94 : vector<8xf32> to vector<8x1xf32>
    %96 = tpu.reciprocal %95 {approx = true} : vector<8x1xf32> -> vector<8x1xf32>
    %97 = vector.broadcast %96 : vector<8x1xf32> to vector<8x8xf32>
    %98 = arith.mulf %93, %97 : vector<8x8xf32>
    %cst_33 = arith.constant dense<0.000000e+00> : vector<8x8xf32>
    %99 = tpu.matmul %98, %79, %cst_33 {dimension_numbers = #tpu.dot_dimension_numbers<[1], [0], [0], [1], [0, 0, 1, 1], [], []>} : vector<8x8xf32>, vector<8x8xf32>, vector<8x8xf32> -> vector<8x8xf32>
    %100 = tpu.concatenate %30, %53, %76, %99 in 1 : vector<8x8xf32>, vector<8x8xf32>, vector<8x8xf32>, vector<8x8xf32> -> vector<8x32xf32>
    %c0_34 = arith.constant 0 : index
    %c0_35 = arith.constant 0 : index
    %c0_36 = arith.constant 0 : index
    %101 = vector.load %arg4[%c0_34, %c0_35, %c0_36] : memref<1x8x32xf32, #tpu.memory_space<vmem>>, vector<1x8x32xf32>
    %102 = vector.shape_cast %101 : vector<1x8x32xf32> to vector<8x32xf32>
    %103 = vector.shape_cast %100 : vector<8x32xf32> to vector<1x8x32xf32>
    tpu.vector_store %arg4[%c0_34, %c0_35, %c0_36], %103 {strides = array<i32>} : memref<1x8x32xf32, #tpu.memory_space<vmem>>, vector<1x8x32xf32>,
    return
  }
  func.func @transform_0(%arg0: i32) -> (i32, i32, i32) {
    %c0_i32 = arith.constant 0 : i32
    %c0_i32_0 = arith.constant 0 : i32
    %c0_i32_1 = arith.constant 0 : i32
    return %arg0, %c0_i32, %c0_i32_0 : i32, i32, i32
  }
  func.func @transform_1(%arg0: i32) -> (i32, i32, i32) {
    %c0_i32 = arith.constant 0 : i32
    %c0_i32_0 = arith.constant 0 : i32
    %c0_i32_1 = arith.constant 0 : i32
    return %arg0, %c0_i32, %c0_i32_0 : i32, i32, i32
  }
  func.func @transform_2(%arg0: i32) -> (i32, i32, i32) {
    %c0_i32 = arith.constant 0 : i32
    %c0_i32_0 = arith.constant 0 : i32
    %c0_i32_1 = arith.constant 0 : i32
    return %arg0, %c0_i32, %c0_i32_0 : i32, i32, i32
  }
  func.func @transform_3(%arg0: i32) -> (i32, i32, i32) {
    %c0_i32 = arith.constant 0 : i32
    %c0_i32_0 = arith.constant 0 : i32
    %c0_i32_1 = arith.constant 0 : i32
    return %arg0, %c0_i32, %c0_i32_0 : i32, i32, i32
  }
}

module attributes {stable_mosaic.version = 11 : i64} {
  func.func @linear_residual_kernel(%arg0: i32, %arg1: i32, %arg2: i32, %arg3: memref<16x64xf32, #tpu.memory_space<vmem>>, %arg4: memref<64x32xf32, #tpu.memory_space<vmem>>, %arg5: memref<1x32xf32, #tpu.memory_space<vmem>>, %arg6: memref<16x32xf32, #tpu.memory_space<vmem>>, %arg7: memref<16x32xf32, #tpu.memory_space<vmem>>, %arg8: memref<16x32xf32, #tpu.memory_space<vmem>>) attributes {dimension_semantics = [#tpu.dimension_semantics<parallel>, #tpu.dimension_semantics<parallel>, #tpu.dimension_semantics<arbitrary>], iteration_bounds = array<i64: 1, 1, 1>, scalar_prefetch = 0 : i64, scratch_operands = 1 : i64, tpu.core_type = #tpu.core_type<tc>, window_params = [{transform_indices = @transform_0, window_bounds = array<i64: 16, 64>}, {transform_indices = @transform_1, window_bounds = array<i64: 64, 32>}, {transform_indices = @transform_2, window_bounds = array<i64: 1, 32>}, {transform_indices = @transform_3, window_bounds = array<i64: 16, 32>}, {transform_indices = @transform_4, window_bounds = array<i64: 16, 32>}]} {
    %c0_i32 = arith.constant 0 : i32
    %0 = arith.cmpi eq, %arg2, %c0_i32 : i32
    %1 = arith.extui %0 : i1 to i32
    %c0_i32_0 = arith.constant 0 : i32
    %2 = arith.cmpi ne, %1, %c0_i32_0 : i32
    scf.if %2 {
      %cst_10 = arith.constant 0.000000e+00 : f32
      %12 = vector.broadcast %cst_10 : f32 to vector<16x32xf32>
      %c0_11 = arith.constant 0 : index
      %c0_12 = arith.constant 0 : index
      %13 = vector.load %arg8[%c0_11, %c0_12] : memref<16x32xf32, #tpu.memory_space<vmem>>, vector<16x32xf32>
      tpu.vector_store %arg8[%c0_11, %c0_12], %12 {strides = array<i32>} : memref<16x32xf32, #tpu.memory_space<vmem>>, vector<16x32xf32>,
    } else {
    }
    %c0 = arith.constant 0 : index
    %c0_1 = arith.constant 0 : index
    %3 = vector.load %arg8[%c0, %c0_1] : memref<16x32xf32, #tpu.memory_space<vmem>>, vector<16x32xf32>
    %c0_2 = arith.constant 0 : index
    %c0_3 = arith.constant 0 : index
    %4 = vector.load %arg3[%c0_2, %c0_3] : memref<16x64xf32, #tpu.memory_space<vmem>>, vector<16x64xf32>
    %c0_4 = arith.constant 0 : index
    %c0_5 = arith.constant 0 : index
    %5 = vector.load %arg4[%c0_4, %c0_5] : memref<64x32xf32, #tpu.memory_space<vmem>>, vector<64x32xf32>
    %cst = arith.constant dense<0.000000e+00> : vector<16x32xf32>
    %6 = tpu.matmul %4, %5, %cst {dimension_numbers = #tpu.dot_dimension_numbers<[1], [0], [0], [1], [0, 0, 1, 1], [], []>} : vector<16x64xf32>, vector<64x32xf32>, vector<16x32xf32> -> vector<16x32xf32>
    %7 = arith.addf %3, %6 : vector<16x32xf32>
    %c0_6 = arith.constant 0 : index
    %c0_7 = arith.constant 0 : index
    %8 = vector.load %arg8[%c0_6, %c0_7] : memref<16x32xf32, #tpu.memory_space<vmem>>, vector<16x32xf32>
    tpu.vector_store %arg8[%c0_6, %c0_7], %7 {strides = array<i32>} : memref<16x32xf32, #tpu.memory_space<vmem>>, vector<16x32xf32>,
    %c0_i32_8 = arith.constant 0 : i32
    %9 = arith.cmpi eq, %arg2, %c0_i32_8 : i32
    %10 = arith.extui %9 : i1 to i32
    %c0_i32_9 = arith.constant 0 : i32
    %11 = arith.cmpi ne, %10, %c0_i32_9 : i32
    scf.if %11 {
      %c0_10 = arith.constant 0 : index
      %c0_11 = arith.constant 0 : index
      %12 = vector.load %arg8[%c0_10, %c0_11] : memref<16x32xf32, #tpu.memory_space<vmem>>, vector<16x32xf32>
      %c0_12 = arith.constant 0 : index
      %c0_13 = arith.constant 0 : index
      %13 = vector.load %arg5[%c0_12, %c0_13] : memref<1x32xf32, #tpu.memory_space<vmem>>, vector<1x32xf32>
      %14 = vector.broadcast %13 : vector<1x32xf32> to vector<16x32xf32>
      %15 = arith.addf %12, %14 : vector<16x32xf32>
      %c0_14 = arith.constant 0 : index
      %c0_15 = arith.constant 0 : index
      %16 = vector.load %arg6[%c0_14, %c0_15] : memref<16x32xf32, #tpu.memory_space<vmem>>, vector<16x32xf32>
      %17 = arith.addf %15, %16 : vector<16x32xf32>
      %c0_16 = arith.constant 0 : index
      %c0_17 = arith.constant 0 : index
      %18 = vector.load %arg7[%c0_16, %c0_17] : memref<16x32xf32, #tpu.memory_space<vmem>>, vector<16x32xf32>
      tpu.vector_store %arg7[%c0_16, %c0_17], %17 {strides = array<i32>} : memref<16x32xf32, #tpu.memory_space<vmem>>, vector<16x32xf32>,
    } else {
    }
    return
  }
  func.func @transform_0(%arg0: i32, %arg1: i32, %arg2: i32) -> (i32, i32) {
    %c0_i32 = arith.constant 0 : i32
    return %arg0, %arg2 : i32, i32
  }
  func.func @transform_1(%arg0: i32, %arg1: i32, %arg2: i32) -> (i32, i32) {
    %c0_i32 = arith.constant 0 : i32
    return %arg2, %arg1 : i32, i32
  }
  func.func @transform_2(%arg0: i32, %arg1: i32, %arg2: i32) -> (i32, i32) {
    %c0_i32 = arith.constant 0 : i32
    %c0_i32_0 = arith.constant 0 : i32
    return %c0_i32, %arg1 : i32, i32
  }
  func.func @transform_3(%arg0: i32, %arg1: i32, %arg2: i32) -> (i32, i32) {
    %c0_i32 = arith.constant 0 : i32
    return %arg0, %arg1 : i32, i32
  }
  func.func @transform_4(%arg0: i32, %arg1: i32, %arg2: i32) -> (i32, i32) {
    %c0_i32 = arith.constant 0 : i32
    return %arg0, %arg1 : i32, i32
  }
}

module attributes {stable_mosaic.version = 11 : i64} {
  func.func @layernorm_kernel(%arg0: i32, %arg1: memref<16x32xf32, #tpu.memory_space<vmem>>, %arg2: memref<1x32xf32, #tpu.memory_space<vmem>>, %arg3: memref<1x32xf32, #tpu.memory_space<vmem>>, %arg4: memref<16x32xf32, #tpu.memory_space<vmem>>) attributes {dimension_semantics = [#tpu.dimension_semantics<parallel>], iteration_bounds = array<i64: 1>, scalar_prefetch = 0 : i64, scratch_operands = 0 : i64, tpu.core_type = #tpu.core_type<tc>, window_params = [{transform_indices = @transform_0, window_bounds = array<i64: 16, 32>}, {pipeline_mode = #tpu.pipeline_mode<synchronous>, transform_indices = @transform_1, window_bounds = array<i64: 1, 32>}, {pipeline_mode = #tpu.pipeline_mode<synchronous>, transform_indices = @transform_2, window_bounds = array<i64: 1, 32>}, {transform_indices = @transform_3, window_bounds = array<i64: 16, 32>}]} {
    %c0 = arith.constant 0 : index
    %c0_0 = arith.constant 0 : index
    %0 = vector.load %arg1[%c0, %c0_0] : memref<16x32xf32, #tpu.memory_space<vmem>>, vector<16x32xf32>
    %cst = arith.constant dense<0.000000e+00> : vector<16xf32>
    %1 = vector.multi_reduction <add>, %0, %cst [1] : vector<16x32xf32> to vector<16xf32>
    %2 = vector.shape_cast %1 : vector<16xf32> to vector<16x1xf32>
    %cst_1 = arith.constant 3.200000e+01 : f32
    %3 = vector.broadcast %cst_1 : f32 to vector<16x1xf32>
    %4 = arith.divf %2, %3 : vector<16x1xf32>
    %5 = vector.broadcast %4 : vector<16x1xf32> to vector<16x32xf32>
    %6 = arith.subf %0, %5 : vector<16x32xf32>
    %7 = arith.mulf %6, %6 : vector<16x32xf32>
    %cst_2 = arith.constant dense<0.000000e+00> : vector<16xf32>
    %8 = vector.multi_reduction <add>, %7, %cst_2 [1] : vector<16x32xf32> to vector<16xf32>
    %9 = vector.shape_cast %8 : vector<16xf32> to vector<16x1xf32>
    %cst_3 = arith.constant 3.100000e+01 : f32
    %10 = vector.broadcast %cst_3 : f32 to vector<16x1xf32>
    %11 = arith.divf %9, %10 : vector<16x1xf32>
    %12 = math.sqrt %11 : vector<16x1xf32>
    %c0_4 = arith.constant 0 : index
    %c0_5 = arith.constant 0 : index
    %13 = vector.load %arg2[%c0_4, %c0_5] : memref<1x32xf32, #tpu.memory_space<vmem>>, vector<1x32xf32>
    %14 = vector.broadcast %4 : vector<16x1xf32> to vector<16x32xf32>
    %15 = arith.subf %0, %14 : vector<16x32xf32>
    %16 = vector.broadcast %13 : vector<1x32xf32> to vector<16x32xf32>
    %17 = arith.mulf %16, %15 : vector<16x32xf32>
    %cst_6 = arith.constant 9.99999997E-7 : f32
    %18 = vector.broadcast %cst_6 : f32 to vector<16x1xf32>
    %19 = arith.addf %12, %18 : vector<16x1xf32>
    %20 = vector.broadcast %19 : vector<16x1xf32> to vector<16x32xf32>
    %21 = arith.divf %17, %20 : vector<16x32xf32>
    %c0_7 = arith.constant 0 : index
    %c0_8 = arith.constant 0 : index
    %22 = vector.load %arg3[%c0_7, %c0_8] : memref<1x32xf32, #tpu.memory_space<vmem>>, vector<1x32xf32>
    %23 = vector.broadcast %22 : vector<1x32xf32> to vector<16x32xf32>
    %24 = arith.addf %21, %23 : vector<16x32xf32>
    %c0_9 = arith.constant 0 : index
    %c0_10 = arith.constant 0 : index
    %25 = vector.load %arg4[%c0_9, %c0_10] : memref<16x32xf32, #tpu.memory_space<vmem>>, vector<16x32xf32>
    tpu.vector_store %arg4[%c0_9, %c0_10], %24 {strides = array<i32>} : memref<16x32xf32, #tpu.memory_space<vmem>>, vector<16x32xf32>,
    return
  }
  func.func @transform_0(%arg0: i32) -> (i32, i32) {
    %c0_i32 = arith.constant 0 : i32
    %c0_i32_0 = arith.constant 0 : i32
    return %arg0, %c0_i32 : i32, i32
  }
  func.func @transform_1(%arg0: i32) -> (i32, i32) {
    %c0_i32 = arith.constant 0 : i32
    %c0_i32_0 = arith.constant 0 : i32
    %c0_i32_1 = arith.constant 0 : i32
    return %c0_i32, %c0_i32_0 : i32, i32
  }
  func.func @transform_2(%arg0: i32) -> (i32, i32) {
    %c0_i32 = arith.constant 0 : i32
    %c0_i32_0 = arith.constant 0 : i32
    %c0_i32_1 = arith.constant 0 : i32
    return %c0_i32, %c0_i32_0 : i32, i32
  }
  func.func @transform_3(%arg0: i32) -> (i32, i32) {
    %c0_i32 = arith.constant 0 : i32
    %c0_i32_0 = arith.constant 0 : i32
    return %arg0, %c0_i32 : i32, i32
  }
}

</mosaic_0001>

<bundles_post_ra>
// kernel: decoder_forward.21
= control target key start
LH: loop header
LB: loop body
LE: loop exit
PB: predicated region body
PF: predicated region fallthrough
CT: control target
= control target key end

     0   :  { %vm21_vm0 = vcmask 261120   ;;  %v171_v3 = vmov 0.0   ;;  %s238_s1 = inlined_call_operand.vmem [shape: f32[32,32], index: 1, kind: input, shape index: {}]   ;;  %s239_s0 = inlined_call_operand.vmem [shape: f32[16,32], index: 0, kind: input, shape index: {}]   ;;  %s240_s2 = inlined_call_operand.vmem [shape: f32[1,32], index: 2, kind: input, shape index: {}]   ;;  %s241_s3 = inlined_call_operand.vmem [shape: f32[16,32], index: 3, kind: input, shape index: {}]   ;;  %s242_s4 = inlined_call_operand.vmem [shape: f32[16,32], index: 4, kind: output, shape index: {}]  }
   0x1   :  { %v28_v0 = vld [vmem:[%s238_s1] sm:$0xff]  ;;  %v29_v1 = vld [vmem:[%s238_s1 + $0x8] sm:$0xff]  ;;  %v30_v2 = vld [vmem:[%s238_s1 + $0x10] sm:$0xff]  ;;  %23 = vst.msk [vmem:[#allocation2 + $0x8] sm:$0xff] %vm21_vm0, %v171_v3 }
   0x2   :  { %22 = vst.msk [vmem:[#allocation2] sm:$0xff] %vm21_vm0, %v171_v3  ;;  %v162_v4 = vpack.c.bf16 %v29_v1, %v28_v0  ;;  %v31_v5 = vld [vmem:[%s238_s1 + $0x18] sm:$0xff]  ;;  %v26_v6 = vld [vmem:[%s239_s0] sm:$0xff]  ;;  %v27_v8 = vld [vmem:[%s239_s0 + $0x8] sm:$0xff] }
   0x3   :  { %v166_v7 = vpack.c.bf16 %v31_v5, %v30_v2  ;;  %159 = vmatprep.mubr.msk.f32.mxu0 %vm21_vm0, %v26_v6  ;;  %v144_v15 = vld [vmem:[%s240_s2] ss:$0 sm:$0xff]  ;;  %v133_v17 = vld [vmem:[%s241_s3 + $0x8] sm:$0xff] }
   0x4   :  { %163 = vmatprep.subr.bf16.mxu0 %v162_v4  ;;  %v132_v20 = vld [vmem:[%s241_s3] sm:$0xff] }
   0x5   :  { %165 = vmatpush3.bf16.msra.mxu0 %v162_v4 }
   0x6   :  { %167 = vmatprep.subr.bf16.mxu0 %v166_v7 }
   0x8   :  { %v25_v9 = vld [vmem:[#allocation2 + $0x8] sm:$0xff] }
   0x9   :  { %169 = vmatpush3.bf16.msra.mxu0 %v166_v7  ;;  %v24_v10 = vld [vmem:[#allocation2] sm:$0xff] }
   0xc   :  { %160 = vmatmul.mubr.msk.f32.vlgmr.msra.gmra.mrb[0].mxu0 %vm21_vm0, %v27_v8 }
  0xdf   :  { %v161_v11 = vpop.f32.mrb[0].mxu0 }
  0xe0   :  { %v115_v12 = vadd.f32 %v161_v11, %v25_v9  ;;  %v105_v13 = vpop.f32.mrb[1].mxu0 }
  0xe1   :  { %v114_v14 = vadd.f32 %v105_v13, %v24_v10 }
  0xe2   :  { %117 = vst.msk [vmem:[#allocation2 + $0x8] sm:$0xff] %vm21_vm0, %v115_v12 }
  0xe3   :  { %116 = vst.msk [vmem:[#allocation2] sm:$0xff] %vm21_vm0, %v114_v14 }
  0xe9   :  { %v122_v16 = vld [vmem:[#allocation2 + $0x8] sm:$0xff] }
  0xea   :  { %v131_v18 = vadd.f32 %v144_v15, %v122_v16  ;;  %v121_v19 = vld [vmem:[#allocation2] sm:$0xff] }
  0xeb   :  { %v130_v21 = vadd.f32 %v144_v15, %v121_v19 }
  0xec   :  { %v135_v22 = vadd.f32 %v133_v17, %v131_v18 }
  0xed   :  { %v134_v23 = vadd.f32 %v132_v20, %v130_v21 }
  0xee   :  { %137 = vst.msk [vmem:[%s242_s4 + $0x8] sm:$0xff] %vm21_vm0, %v135_v22 }
  0xef   :  { %136 = vst.msk [vmem:[%s242_s4] sm:$0xff] %vm21_vm0, %v134_v23 }

// kernel: decoder_forward.19
= control target key start
LH: loop header
LB: loop body
LE: loop exit
PB: predicated region body
PF: predicated region fallthrough
CT: control target
= control target key end

     0   :  { %vm22_vm0 = vcmask 261120   ;;  %vm175_vm5 = vcmask 785408   ;;  %s289_s0 = inlined_call_operand.vmem [shape: f32[16,32], index: 0, kind: input, shape index: {}]   ;;  %s290_s3 = inlined_call_operand.vmem [shape: f32[32,96], index: 3, kind: input, shape index: {}]   ;;  %s291_s1 = inlined_call_operand.vmem [shape: f32[1,32], index: 1, kind: input, shape index: {}]   ;;  %s292_s2 = inlined_call_operand.vmem [shape: f32[1,32], index: 2, kind: input, shape index: {}]   ;;  %s293_s4 = inlined_call_operand.vmem [shape: f32[1,96], index: 4, kind: input, shape index: {}]   ;;  %s294_s5 = inlined_call_operand.vmem [shape: f32[16,96], index: 5, kind: output, shape index: {}]  }
   0x1   :  { %v20_v0 = vld [vmem:[%s289_s0] sm:$0xff]  ;;  %v21_v1 = vld [vmem:[%s289_s0 + $0x8] sm:$0xff]  ;;  %v85_v16 = vld [vmem:[%s290_s3 + $0x10] sm:$0xff] }
   0x2   :  { %v23_v2 = vsel %vm22_vm0, %v20_v0, 0.0  ;;  %v26_v3 = vsel %vm22_vm0, %v21_v1, 0.0  ;;  %v83_v14 = vld [vmem:[%s290_s3] sm:$0xff]  ;;  %v84_v15 = vld [vmem:[%s290_s3 + $0x8] sm:$0xff]  ;;  %v86_v18 = vld [vmem:[%s290_s3 + $0x18] sm:$0xff] }
   0x3   :  { %24 = vadd.xlane.f32.xlu0 %v23_v2  ;;  %v204_v17 = vpack.c.bf16 %v84_v15, %v83_v14  ;;  %v208_v19 = vpack.c.bf16 %v86_v18, %v85_v16  ;;  %v182_v36 = vld [vmem:[%s291_s1] ss:$0 sm:$0xff] }
   0x4   :  { %v183_v39 = vld [vmem:[%s292_s2] ss:$0 sm:$0xff] }
   0x5   :  { %205 = vmatprep.subr.bf16.mxu0 %v204_v17  ;;  %v184_v46 = vld [vmem:[%s293_s4] ss:$0 sm:$0xff] }
   0x6   :  { %207 = vmatpush3.bf16.msra.mxu0 %v204_v17 }
   0x7   :  { %27 = vadd.xlane.f32.xlu0 %v26_v3  ;;  %209 = vmatprep.subr.bf16.mxu0 %v208_v19 }
   0xa   :  { %211 = vmatpush3.bf16.msra.mxu0 %v208_v19 }
  0x90   :  { %v25_v4 = vpop.xlane.xlu0 %24 }
  0x91   :  { %v30_v5 = vmul.f32 0.03125, %v25_v4 }
  0x93   :  { %v32_v6 = vsub.f32 %v20_v0, %v30_v5 }
  0x94   :  { %v28_v7 = vpop.xlane.xlu0 %27 }
  0x95   :  { %v31_v8 = vmul.f32 0.03125, %v28_v7  ;;  %v34_v9 = vmul.f32 %v32_v6, %v32_v6  ;;  %v66_v37 = vmul.f32 %v182_v36, %v32_v6 }
  0x97   :  { %v33_v10 = vsub.f32 %v21_v1, %v31_v8  ;;  %v36_v11 = vsel %vm22_vm0, %v34_v9, 0.0 }
  0x98   :  { %37 = vadd.xlane.f32.xlu1 %v36_v11 }
  0x99   :  { %v35_v12 = vmul.f32 %v33_v10, %v33_v10  ;;  %v67_v41 = vmul.f32 %v182_v36, %v33_v10 }
  0x9b   :  { %v39_v13 = vsel %vm22_vm0, %v35_v12, 0.0 }
  0x9c   :  { %40 = vadd.xlane.f32.xlu1 %v39_v13 }
 0x125   :  { %v38_v20 = vpop.xlane.xlu1 %37 }
 0x126   :  { %v43_v21 = vmul.f32 0.032258064, %v38_v20 }
 0x128   :  { %212 = vrsqrt.f32 %v43_v21  ;;  %vm47_vm1 = vcmp.eq.f32.partialorder %v43_v21, inf  ;;  %v50_v26 = vand.u32 2147483648, %v43_v21  ;;  %vm49_vm2 = vcmp.eq.f32.partialorder %v43_v21, 0.0 }
 0x129   :  { %v41_v22 = vpop.xlane.xlu1 %40 }
 0x12a   :  { %v44_v23 = vmul.f32 0.032258064, %v41_v22 }
 0x12c   :  { %214 = vrsqrt.f32 %v44_v23  ;;  %vm54_vm3 = vcmp.eq.f32.partialorder %v44_v23, inf  ;;  %v57_v32 = vand.u32 2147483648, %v44_v23  ;;  %vm56_vm4 = vcmp.eq.f32.partialorder %v44_v23, 0.0 }
 0x132   :  { %v213_v24 = vpop.eup %212 }
 0x133   :  { %v46_v25 = vmul.f32 %v213_v24, %v43_v21 }
 0x135   :  { %v48_v27 = vsel %vm47_vm1, %v43_v21, %v46_v25 }
 0x136   :  { %v215_v28 = vpop.eup %214  ;;  %v51_v29 = vsel %vm49_vm2, %v50_v26, %v48_v27 }
 0x137   :  { %v53_v30 = vmul.f32 %v215_v28, %v44_v23  ;;  %v68_v31 = vadd.f32 1e-06, %v51_v29 }
 0x139   :  { %v55_v33 = vsel %vm54_vm3, %v44_v23, %v53_v30  ;;  %216 = vrcp.f32 %v68_v31 }
 0x13a   :  { %v58_v34 = vsel %vm56_vm4, %v57_v32, %v55_v33 }
 0x13b   :  { %v69_v35 = vadd.f32 1e-06, %v58_v34 }
 0x13d   :  { %218 = vrcp.f32 %v69_v35 }
 0x143   :  { %v217_v38 = vpop.eup %216 }
 0x144   :  { %v71_v40 = vmul.f32 %v217_v38, %v66_v37 }
 0x146   :  { %v81_v42 = vadd.f32 %v183_v39, %v71_v40 }
 0x147   :  { %v219_v43 = vpop.eup %218 }
 0x148   :  { %v73_v44 = vmul.f32 %v219_v43, %v67_v41  ;;  %201 = vmatprep.mubr.msk.f32.mxu0 %vm22_vm0, %v81_v42 }
 0x14a   :  { %v82_v45 = vadd.f32 %v183_v39, %v73_v44 }
 0x14c   :  { %202 = vmatmul.mubr.msk.f32.vlgmr.msra.gmra.mrb[0].mxu0 %vm22_vm0, %v82_v45 }
 0x21f   :  { %v203_v47 = vpop.f32.mrb[0].mxu0 }
 0x220   :  { %v172_v48 = vadd.f32 %v203_v47, %v184_v46  ;;  %v166_v49 = vpop.f32.mrb[1].mxu0 }
 0x221   :  { %v167_v50 = vadd.f32 %v184_v46, %v166_v49 }
 0x222   :  { %177 = vst.msk [vmem:[%s294_s5 + $0x8] sm:$0xff] %vm175_vm5, %v172_v48 }
 0x223   :  { %176 = vst.msk [vmem:[%s294_s5] sm:$0xff] %vm175_vm5, %v167_v50 }

// kernel: decoder_forward.22
= control target key start
LH: loop header
LB: loop body
LE: loop exit
PB: predicated region body
PF: predicated region fallthrough
CT: control target
= control target key end

     0   :  { %vm22_vm0 = vcmask 261120   ;;  %s290_s0 = inlined_call_operand.vmem [shape: f32[16,32], index: 0, kind: input, shape index: {}]   ;;  %s291_s3 = inlined_call_operand.vmem [shape: f32[32,32], index: 3, kind: input, shape index: {}]   ;;  %s292_s1 = inlined_call_operand.vmem [shape: f32[1,32], index: 1, kind: input, shape index: {}]   ;;  %s293_s2 = inlined_call_operand.vmem [shape: f32[1,32], index: 2, kind: input, shape index: {}]   ;;  %s294_s4 = inlined_call_operand.vmem [shape: f32[1,32], index: 4, kind: input, shape index: {}]   ;;  %s295_s5 = inlined_call_operand.vmem [shape: f32[16,32], index: 5, kind: output, shape index: {}]  }
   0x1   :  { %v20_v0 = vld [vmem:[%s290_s0] sm:$0xff]  ;;  %v21_v1 = vld [vmem:[%s290_s0 + $0x8] sm:$0xff]  ;;  %v85_v16 = vld [vmem:[%s291_s3 + $0x10] sm:$0xff] }
   0x2   :  { %v23_v2 = vsel %vm22_vm0, %v20_v0, 0.0  ;;  %v26_v3 = vsel %vm22_vm0, %v21_v1, 0.0  ;;  %v83_v14 = vld [vmem:[%s291_s3] sm:$0xff]  ;;  %v84_v15 = vld [vmem:[%s291_s3 + $0x8] sm:$0xff]  ;;  %v86_v18 = vld [vmem:[%s291_s3 + $0x18] sm:$0xff] }
   0x3   :  { %24 = vadd.xlane.f32.xlu0 %v23_v2  ;;  %v203_v17 = vpack.c.bf16 %v84_v15, %v83_v14  ;;  %v207_v19 = vpack.c.bf16 %v86_v18, %v85_v16  ;;  %v181_v36 = vld [vmem:[%s292_s1] ss:$0 sm:$0xff] }
   0x4   :  { %v182_v39 = vld [vmem:[%s293_s2] ss:$0 sm:$0xff] }
   0x5   :  { %204 = vmatprep.subr.bf16.mxu0 %v203_v17  ;;  %v183_v46 = vld [vmem:[%s294_s4] ss:$0 sm:$0xff] }
   0x6   :  { %206 = vmatpush3.bf16.msra.mxu0 %v203_v17 }
   0x7   :  { %27 = vadd.xlane.f32.xlu0 %v26_v3  ;;  %208 = vmatprep.subr.bf16.mxu0 %v207_v19 }
   0xa   :  { %210 = vmatpush3.bf16.msra.mxu0 %v207_v19 }
  0x90   :  { %v25_v4 = vpop.xlane.xlu0 %24 }
  0x91   :  { %v30_v5 = vmul.f32 0.03125, %v25_v4 }
  0x93   :  { %v32_v6 = vsub.f32 %v20_v0, %v30_v5 }
  0x94   :  { %v28_v7 = vpop.xlane.xlu0 %27 }
  0x95   :  { %v31_v8 = vmul.f32 0.03125, %v28_v7  ;;  %v34_v9 = vmul.f32 %v32_v6, %v32_v6  ;;  %v66_v37 = vmul.f32 %v181_v36, %v32_v6 }
  0x97   :  { %v33_v10 = vsub.f32 %v21_v1, %v31_v8  ;;  %v36_v11 = vsel %vm22_vm0, %v34_v9, 0.0 }
  0x98   :  { %37 = vadd.xlane.f32.xlu1 %v36_v11 }
  0x99   :  { %v35_v12 = vmul.f32 %v33_v10, %v33_v10  ;;  %v67_v41 = vmul.f32 %v181_v36, %v33_v10 }
  0x9b   :  { %v39_v13 = vsel %vm22_vm0, %v35_v12, 0.0 }
  0x9c   :  { %40 = vadd.xlane.f32.xlu1 %v39_v13 }
 0x125   :  { %v38_v20 = vpop.xlane.xlu1 %37 }
 0x126   :  { %v43_v21 = vmul.f32 0.032258064, %v38_v20 }
 0x128   :  { %211 = vrsqrt.f32 %v43_v21  ;;  %vm47_vm1 = vcmp.eq.f32.partialorder %v43_v21, inf  ;;  %v50_v26 = vand.u32 2147483648, %v43_v21  ;;  %vm49_vm2 = vcmp.eq.f32.partialorder %v43_v21, 0.0 }
 0x129   :  { %v41_v22 = vpop.xlane.xlu1 %40 }
 0x12a   :  { %v44_v23 = vmul.f32 0.032258064, %v41_v22 }
 0x12c   :  { %213 = vrsqrt.f32 %v44_v23  ;;  %vm54_vm3 = vcmp.eq.f32.partialorder %v44_v23, inf  ;;  %v57_v32 = vand.u32 2147483648, %v44_v23  ;;  %vm56_vm4 = vcmp.eq.f32.partialorder %v44_v23, 0.0 }
 0x132   :  { %v212_v24 = vpop.eup %211 }
 0x133   :  { %v46_v25 = vmul.f32 %v212_v24, %v43_v21 }
 0x135   :  { %v48_v27 = vsel %vm47_vm1, %v43_v21, %v46_v25 }
 0x136   :  { %v214_v28 = vpop.eup %213  ;;  %v51_v29 = vsel %vm49_vm2, %v50_v26, %v48_v27 }
 0x137   :  { %v53_v30 = vmul.f32 %v214_v28, %v44_v23  ;;  %v68_v31 = vadd.f32 1e-06, %v51_v29 }
 0x139   :  { %v55_v33 = vsel %vm54_vm3, %v44_v23, %v53_v30  ;;  %215 = vrcp.f32 %v68_v31 }
 0x13a   :  { %v58_v34 = vsel %vm56_vm4, %v57_v32, %v55_v33 }
 0x13b   :  { %v69_v35 = vadd.f32 1e-06, %v58_v34 }
 0x13d   :  { %217 = vrcp.f32 %v69_v35 }
 0x143   :  { %v216_v38 = vpop.eup %215 }
 0x144   :  { %v71_v40 = vmul.f32 %v216_v38, %v66_v37 }
 0x146   :  { %v81_v42 = vadd.f32 %v182_v39, %v71_v40 }
 0x147   :  { %v218_v43 = vpop.eup %217 }
 0x148   :  { %v73_v44 = vmul.f32 %v218_v43, %v67_v41  ;;  %200 = vmatprep.mubr.msk.f32.mxu0 %vm22_vm0, %v81_v42 }
 0x14a   :  { %v82_v45 = vadd.f32 %v182_v39, %v73_v44 }
 0x14c   :  { %201 = vmatmul.mubr.msk.f32.vlgmr.msra.gmra.mrb[0].mxu0 %vm22_vm0, %v82_v45 }
 0x21f   :  { %v202_v47 = vpop.f32.mrb[0].mxu0 }
 0x220   :  { %v172_v48 = vadd.f32 %v202_v47, %v183_v46  ;;  %v166_v49 = vpop.f32.mrb[1].mxu0 }
 0x221   :  { %v167_v50 = vadd.f32 %v183_v46, %v166_v49 }
 0x222   :  { %176 = vst.msk [vmem:[%s295_s5 + $0x8] sm:$0xff] %vm22_vm0, %v172_v48 }
 0x223   :  { %175 = vst.msk [vmem:[%s295_s5] sm:$0xff] %vm22_vm0, %v167_v50 }

// kernel: decoder_forward.20
= control target key start
LH: loop header
LB: loop body
LE: loop exit
PB: predicated region body
PF: predicated region fallthrough
CT: control target
= control target key end

     0   :  { %s1038_s9 = smov 0   ;;  %s1138_s0 = inlined_call_operand.vmem [shape: f32[2,8,96], index: 0, kind: input, shape index: {}]   ;;  %s1139_s1 = inlined_call_operand.vmem [shape: s32[1,8,8], index: 1, kind: input, shape index: {}]   ;;  %s1140_s2 = inlined_call_operand.vmem [shape: f32[2,8,32], index: 2, kind: output, shape index: {}]  }
   0x1 LB: > { %s882_s10 = sadd.s32 4294967295, %s1005_s9   ;;  %p886_p0 = scmp.ge.s32.totalorder %s1005_s9, 1  ;;  %s1005_s9 = sphi %s1038_s9, %s12_s9  }
   0x2   : > { %p111_p1 = scmp.lt.s32.totalorder %s1005_s9, 3 }
   0x4   : > { %p112_p2 = pnand %p886_p0, %p111_p1 }
   0x5   : > { %p131_p3 = scmp.lt.s32.totalorder (!%p112_p2), %s882_s10, 1  ;;  %v1007_v0 = vmov (!%p112_p2), 0.0   ;;  %vm1008_vm0 = vmmov (!%p112_p2), 0   ;;  %s1009_s15 = smov (!%p112_p2), 96   ;;  %vm144_vm1 = vcmask (!%p112_p2), 64512   ;;  %v1076_v3 = vld [vmem:[%s1139_s1] sm:$0xff] (!%p112_p2) }
   0x6   : > { %115 = sbr.rel (%p112_p2) target bundleno = 1534 (0x5fe), region = 28  ;;  %919 = vmatprep.subr.mxu0 (!%p112_p2), %v1007_v0  ;;  %921 = vmatprep.mubr.msk.f32.mxu0 (!%p112_p2), %vm1008_vm0, %v1007_v0  ;;  %s1010_s16 = smov (!%p112_p2), 64   ;;  %vm220_vm2 = vcmp.eq.s32.totalorder (!%p112_p2), %v1076_v3, 0  ;;  %vm823_vm3 = vcmask (!%p112_p2), 130048   ;;  %vm825_vm4 = vcmask (!%p112_p2), 195584   ;;  %vm827_vm5 = vcmask (!%p112_p2), 261120  }
   0x7   : > { %924 = vmatprep.subr.mxu1 (!%p112_p2), %v1007_v0  ;;  %926 = vmatprep.mubr.msk.f32.mxu1 (!%p112_p2), %vm1008_vm0, %v1007_v0  ;;  %s1011_s17 = smov (!%p112_p2), 88   ;;  %s1012_s18 = smov (!%p112_p2), 120  }
   0x8   : > { %s1013_s19 = smov (!%p112_p2), 80   ;;  %s1014_s22 = smov (!%p112_p2), 72  }
   0x9   : > { %s1015_s23 = smov (!%p112_p2), 112   ;;  %s1016_s24 = smov (!%p112_p2), 104  }
   0xa   : > { %s1017_s25 = smov (!%p112_p2), 56   ;;  %s1018_s26 = smov (!%p112_p2), 40  }
   0xb   : > { %s1019_s27 = smov (!%p112_p2), 48   ;;  %s1020_s28 = smov (!%p112_p2), 8  }
   0xc   : > { %s1021_s29 = smov (!%p112_p2), 16   ;;  %s1022_s30 = smov (!%p112_p2), 24  }
   0xd   : > { %s1142_s10 = smov (!%p131_p3, %s882_s10), 1 }
   0xe   : > { %s887_s11 = sshll.u32 %s1142_s10, 3 }
   0xf   : > { %s134_s14 = scalar_lea.vmem %s1138_s0, %s887_s11  ;;  %s138_s5 = scalar_lea.vmem %s1140_s2, %s887_s11 }
  0x10   : > { %v1060_v1 = vld [vmem:[%s134_s14] sm:$0xff] }
  0x11   : > { %142 = vrot.lane.b32.xlu0 %v1060_v1, %s1009_s15  ;;  %233 = vrot.lane.b32.xlu1 %v1060_v1, %s1010_s16 }
  0x15   : > { %311 = vrot.lane.b32.xlu1 %v1060_v1, %s1011_s17 }
  0x19   : > { %309 = vrot.lane.b32.xlu1 %v1060_v1, %s1012_s18 }
  0x1d   : > { %478 = vrot.lane.b32.xlu1 %v1060_v1, %s1013_s19 }
  0x83   : > { %v143_v2 = vpop.permute.xlu0 %142  ;;  %v234_v9 = vpop.permute.xlu1 %233 }
  0x84   : > { %920 = vmatpush3.xpose.msk.msra.mxu0 %vm144_vm1, %v143_v2  ;;  %925 = vmatpush3.msra.mxu1 %v234_v9 }
  0x85   : > { %934 = vmatprep.subr.mxu0 %v1007_v0  ;;  %929 = vmatprep.subr.mxu1 %v1007_v0 }
  0x87   : > { %922 = vmatmul.mubr.msk.f32.vlgmr.msra.gmra.mrb[0].mxu0 %vm144_vm1, %v1060_v1  ;;  %v312_v15 = vpop.permute.xlu1 %311 }
  0x88   : > { %936 = vmatprep.mubr.msk.f32.mxu0 %vm1008_vm0, %v1007_v0 }
  0x8b   : > { %v310_v16 = vpop.permute.xlu1 %309 }
  0x8f   : > { %v479_v17 = vpop.permute.xlu1 %478 }
 0x15a   : > { %v215_v4 = vpop.f32.mrb[0].mxu0 }
 0x15b   : > { %v219_v5 = vmul.f32 0.35355338, %v215_v4  ;;  %v923_v6 = vpop.f32.mrb[1].mxu0 }
 0x15d   : > { %v221_v7 = vsel %vm220_vm2, -1e+09, %v219_v5 }
 0x15e   : > { %v222_v8 = vsel %vm144_vm1, %v221_v7, -inf }
 0x15f   : > { %223 = vmax.xlane.f32.xlu0 %v222_v8 }
 0x175   : > { %645 = vrot.lane.b32.xlu0 %v1060_v1, %s1014_s22 }
 0x1ec   : > { %v224_v10 = vpop.xlane.xlu0 %223 }
 0x1ed   : > { %v225_v11 = vsub.f32 %v221_v7, %v224_v10 }
 0x1ef   : > { %v226_v12 = vmul.f32 1.442695, %v225_v11 }
 0x1f0   : > { %v646_v22 = vpop.permute.xlu0 %645 }
 0x1f1   : > { %983 = vpow2.f32 %v226_v12 }
 0x1fb   : > { %v984_v13 = vpop.eup %983 }
 0x1fc   : > { %v228_v14 = vsel %vm144_vm1, %v984_v13, 0.0 }
 0x1fd   : > { %229 = vadd.xlane.f32.xlu1 %v228_v14 }
 0x20e   : > { %476 = vrot.lane.b32.xlu1 %v1060_v1, %s1015_s23 }
 0x212   : > { %643 = vrot.lane.b32.xlu1 %v1060_v1, %s1016_s24 }
 0x28a   : > { %v230_v18 = vpop.xlane.xlu1 %229 }
 0x28b   : > { %985 = vrcp.f32 %v230_v18 }
 0x28e   : > { %v477_v21 = vpop.permute.xlu1 %476 }
 0x292   : > { %v644_v23 = vpop.permute.xlu1 %643 }
 0x295   : > { %v986_v19 = vpop.eup %985 }
 0x296   : > { %v232_v20 = vmul.f32 %v986_v19, %v984_v13 }
 0x298   : > { %927 = vmatmul.mubr.msk.f32.vlgmr.msra.gmra.mrb[0].mxu1 %vm144_vm1, %v232_v20 }
 0x299   : > { %930 = vmatpush3.xpose.msk.msra.mxu1 %vm144_vm1, %v312_v15  ;;  %931 = vmatprep.mubr.msk.f32.mxu1 %vm1008_vm0, %v1007_v0 }
 0x29a   : > { %939 = vmatprep.subr.mxu1 %v1007_v0 }
 0x29c   : > { %932 = vmatmul.mubr.msk.f32.vlgmr.msra.gmra.mrb[2].mxu1 %vm144_vm1, %v310_v16 }
 0x29d   : > { %940 = vmatpush3.xpose.msk.msra.mxu1 %vm144_vm1, %v479_v17  ;;  %941 = vmatprep.mubr.msk.f32.mxu1 %vm1008_vm0, %v1007_v0 }
 0x29e   : > { %949 = vmatprep.subr.mxu1 %v1007_v0 }
 0x2a0   : > { %942 = vmatmul.mubr.msk.f32.vlgmr.msra.gmra.mrb[4].mxu1 %vm144_vm1, %v477_v21 }
 0x2a1   : > { %950 = vmatpush3.xpose.msk.msra.mxu1 %vm144_vm1, %v646_v22  ;;  %951 = vmatprep.mubr.msk.f32.mxu1 %vm1008_vm0, %v1007_v0 }
 0x2a4   : > { %952 = vmatmul.mubr.msk.f32.vlgmr.msra.gmra.mrb[6].mxu1 %vm144_vm1, %v644_v23 }
 0x36b   : > { %v1102_v24 = vpop.f32.mrb[0].mxu1 }
 0x36c   : > { %v928_v25 = vpop.f32.mrb[1].mxu1 }
 0x36f   : > { %v383_v26 = vpop.f32.mrb[2].mxu1 }
 0x370   : > { %v387_v27 = vmul.f32 0.35355338, %v383_v26  ;;  %v933_v28 = vpop.f32.mrb[3].mxu1 }
 0x372   : > { %v388_v29 = vsel %vm220_vm2, -1e+09, %v387_v27 }
 0x373   : > { %v550_v30 = vpop.f32.mrb[4].mxu1  ;;  %v389_v31 = vsel %vm144_vm1, %v388_v29, -inf }
 0x374   : > { %v554_v32 = vmul.f32 0.35355338, %v550_v30  ;;  %390 = vmax.xlane.f32.xlu1 %v389_v31  ;;  %v943_v33 = vpop.f32.mrb[5].mxu1 }
 0x376   : > { %v555_v34 = vsel %vm220_vm2, -1e+09, %v554_v32 }
 0x377   : > { %v717_v35 = vpop.f32.mrb[6].mxu1  ;;  %v556_v36 = vsel %vm144_vm1, %v555_v34, -inf }
 0x378   : > { %v721_v37 = vmul.f32 0.35355338, %v717_v35  ;;  %557 = vmax.xlane.f32.xlu0 %v556_v36  ;;  %v953_v38 = vpop.f32.mrb[7].mxu1 }
 0x37a   : > { %v722_v39 = vsel %vm220_vm2, -1e+09, %v721_v37 }
 0x37b   : > { %v723_v40 = vsel %vm144_vm1, %v722_v39, -inf }
 0x37c   : > { %724 = vmax.xlane.f32.xlu1 %v723_v40 }
 0x38d   : > { %400 = vrot.lane.b32.xlu1 %v1060_v1, %s1017_s25 }
 0x401   : > { %v391_v41 = vpop.xlane.xlu1 %390 }
 0x402   : > { %v392_v42 = vsub.f32 %v388_v29, %v391_v41 }
 0x404   : > { %v393_v43 = vmul.f32 1.442695, %v392_v42 }
 0x405   : > { %v558_v44 = vpop.xlane.xlu0 %557 }
 0x406   : > { %987 = vpow2.f32 %v393_v43  ;;  %v559_v45 = vsub.f32 %v555_v34, %v558_v44 }
 0x408   : > { %v560_v46 = vmul.f32 1.442695, %v559_v45 }
 0x409   : > { %v725_v47 = vpop.xlane.xlu1 %724 }
 0x40a   : > { %989 = vpow2.f32 %v560_v46  ;;  %v726_v48 = vsub.f32 %v722_v39, %v725_v47 }
 0x40c   : > { %v727_v49 = vmul.f32 1.442695, %v726_v48 }
 0x40d   : > { %v401_v50 = vpop.permute.xlu1 %400 }
 0x40e   : > { %991 = vpow2.f32 %v727_v49  ;;  %935 = vmatpush3.msra.mxu0 %v401_v50 }
 0x40f   : > { %944 = vmatprep.subr.mxu0 %v1007_v0 }
 0x410   : > { %v988_v51 = vpop.eup %987 }
 0x411   : > { %v395_v52 = vsel %vm144_vm1, %v988_v51, 0.0 }
 0x412   : > { %396 = vadd.xlane.f32.xlu1 %v395_v52 }
 0x414   : > { %v990_v53 = vpop.eup %989 }
 0x415   : > { %v562_v54 = vsel %vm144_vm1, %v990_v53, 0.0 }
 0x416   : > { %563 = vadd.xlane.f32.xlu1 %v562_v54 }
 0x418   : > { %v992_v55 = vpop.eup %991 }
 0x419   : > { %v729_v56 = vsel %vm144_vm1, %v992_v55, 0.0 }
 0x41a   : > { %730 = vadd.xlane.f32.xlu0 %v729_v56 }
 0x427   : > { %734 = vrot.lane.b32.xlu1 %v1060_v1, %s1018_s26 }
 0x430   : > { %567 = vrot.lane.b32.xlu0 %v1060_v1, %s1019_s27 }
 0x49f   : > { %v397_v57 = vpop.xlane.xlu1 %396 }
 0x4a0   : > { %993 = vrcp.f32 %v397_v57 }
 0x4a3   : > { %v564_v58 = vpop.xlane.xlu1 %563 }
 0x4a4   : > { %995 = vrcp.f32 %v564_v58 }
 0x4a7   : > { %v731_v59 = vpop.xlane.xlu0 %730  ;;  %v735_v3 = vpop.permute.xlu1 %734 }
 0x4a8   : > { %997 = vrcp.f32 %v731_v59 }
 0x4aa   : > { %v994_v60 = vpop.eup %993 }
 0x4ab   : > { %v399_v61 = vmul.f32 %v994_v60, %v988_v51  ;;  %v568_v62 = vpop.permute.xlu0 %567 }
 0x4ad   : > { %937 = vmatmul.mubr.msk.f32.vlgmr.msra.gmra.mrb[2].mxu0 %vm144_vm1, %v399_v61 }
 0x4ae   : > { %v996_v63 = vpop.eup %995  ;;  %945 = vmatpush3.msra.mxu0 %v568_v62  ;;  %946 = vmatprep.mubr.msk.f32.mxu0 %vm1008_vm0, %v1007_v0 }
 0x4af   : > { %v566_v2 = vmul.f32 %v996_v63, %v990_v53  ;;  %954 = vmatprep.subr.mxu0 %v1007_v0 }
 0x4b1   : > { %947 = vmatmul.mubr.msk.f32.vlgmr.msra.gmra.mrb[4].mxu0 %vm144_vm1, %v566_v2 }
 0x4b2   : > { %v998_v1 = vpop.eup %997  ;;  %955 = vmatpush3.msra.mxu0 %v735_v3  ;;  %956 = vmatprep.mubr.msk.f32.mxu0 %vm1008_vm0, %v1007_v0 }
 0x4b3   : > { %v733_v4 = vmul.f32 %v998_v1, %v992_v55 }
 0x4b5   : > { %957 = vmatmul.mubr.msk.f32.vlgmr.msra.gmra.mrb[6].mxu0 %vm144_vm1, %v733_v4 }
 0x580   : > { %v472_v5 = vpop.f32.mrb[2].mxu0 }
 0x581   : > { %811 = vrot.lane.b32.xlu1 %v472_v5, %s1020_s28  ;;  %v938_v6 = vpop.f32.mrb[3].mxu0 }
 0x584   : > { %v639_v7 = vpop.f32.mrb[4].mxu0 }
 0x585   : > { %815 = vrot.lane.b32.xlu0 %v639_v7, %s1021_s29  ;;  %v948_v8 = vpop.f32.mrb[5].mxu0 }
 0x588   : > { %v806_v9 = vpop.f32.mrb[6].mxu0 }
 0x589   : > { %819 = vrot.lane.b32.xlu1 %v806_v9, %s1022_s30  ;;  %v958_v10 = vpop.f32.mrb[7].mxu0 }
 0x5f3   : > { %v812_v11 = vpop.permute.xlu1 %811 }
 0x5f4   : > { %v822_v0 = vsel %vm144_vm1, %v1102_v24, %v812_v11 }
 0x5f7   : > { %v816_v12 = vpop.permute.xlu0 %815 }
 0x5f8   : > { %v824_v13 = vsel %vm823_vm3, %v822_v0, %v816_v12 }
 0x5fb   : > { %v820_v14 = vpop.permute.xlu1 %819 }
 0x5fc   : > { %v826_v15 = vsel %vm825_vm4, %v824_v13, %v820_v14 }
 0x5fd   : > { %828 = vst.msk [vmem:[%s138_s5] sm:$0xff] %vm827_vm5, %v826_v15 }
 0x5fe PF: > { %s12_s9 = sadd.s32 1, %s1005_s9  }
 0x5ff   : > { %p9_p4 = scmp.ge.s32.totalorder %s12_s9, 4  }
 0x601   :  { %11 = sbr.rel (!%p9_p4) target bundleno = 1 (0x1), region = 58 }

// kernel: decoder_forward.23
= control target key start
LH: loop header
LB: loop body
LE: loop exit
PB: predicated region body
PF: predicated region fallthrough
CT: control target
= control target key end

     0   :  { %vm29_vm0 = vcmask 261120   ;;  %vm18_vm1 = vcmask 523264   ;;  %v165_v3 = vmov 0.0   ;;  %s221_s1 = inlined_call_operand.vmem [shape: f32[32,64], index: 1, kind: input, shape index: {}]   ;;  %s222_s0 = inlined_call_operand.vmem [shape: f32[16,32], index: 0, kind: input, shape index: {}]   ;;  %s223_s2 = inlined_call_operand.vmem [shape: f32[1,64], index: 2, kind: input, shape index: {}]   ;;  %s224_s3 = inlined_call_operand.vmem [shape: f32[16,64], index: 3, kind: output, shape index: {}]  }
   0x1   :  { %v25_v0 = vld [vmem:[%s221_s1] sm:$0xff]  ;;  %v26_v1 = vld [vmem:[%s221_s1 + $0x8] sm:$0xff]  ;;  %v27_v2 = vld [vmem:[%s221_s1 + $0x10] sm:$0xff]  ;;  %20 = vst.msk [vmem:[#allocation2 + $0x8] sm:$0xff] %vm18_vm1, %v165_v3 }
   0x2   :  { %19 = vst.msk [vmem:[#allocation2] sm:$0xff] %vm18_vm1, %v165_v3  ;;  %v156_v4 = vpack.c.bf16 %v26_v1, %v25_v0  ;;  %v28_v5 = vld [vmem:[%s221_s1 + $0x18] sm:$0xff]  ;;  %v23_v6 = vld [vmem:[%s222_s0] sm:$0xff]  ;;  %v24_v8 = vld [vmem:[%s222_s0 + $0x8] sm:$0xff] }
   0x3   :  { %v160_v7 = vpack.c.bf16 %v28_v5, %v27_v2  ;;  %153 = vmatprep.mubr.msk.f32.mxu0 %vm29_vm0, %v23_v6  ;;  %v138_v15 = vld [vmem:[%s223_s2] ss:$0 sm:$0xff] }
   0x4   :  { %157 = vmatprep.subr.bf16.mxu0 %v156_v4 }
   0x5   :  { %159 = vmatpush3.bf16.msra.mxu0 %v156_v4 }
   0x6   :  { %161 = vmatprep.subr.bf16.mxu0 %v160_v7 }
   0x8   :  { %v22_v9 = vld [vmem:[#allocation2 + $0x8] sm:$0xff] }
   0x9   :  { %163 = vmatpush3.bf16.msra.mxu0 %v160_v7  ;;  %v21_v10 = vld [vmem:[#allocation2] sm:$0xff] }
   0xc   :  { %154 = vmatmul.mubr.msk.f32.vlgmr.msra.gmra.mrb[0].mxu0 %vm29_vm0, %v24_v8 }
  0xdf   :  { %v155_v11 = vpop.f32.mrb[0].mxu0 }
  0xe0   :  { %v112_v12 = vadd.f32 %v155_v11, %v22_v9  ;;  %v102_v13 = vpop.f32.mrb[1].mxu0 }
  0xe1   :  { %v111_v14 = vadd.f32 %v102_v13, %v21_v10 }
  0xe2   :  { %115 = vst.msk [vmem:[#allocation2 + $0x8] sm:$0xff] %vm18_vm1, %v112_v12 }
  0xe3   :  { %114 = vst.msk [vmem:[#allocation2] sm:$0xff] %vm18_vm1, %v111_v14 }
  0xe9   :  { %v120_v16 = vld [vmem:[#allocation2 + $0x8] sm:$0xff] }
  0xea   :  { %v129_v17 = vadd.f32 %v138_v15, %v120_v16  ;;  %v119_v18 = vld [vmem:[#allocation2] sm:$0xff] }
  0xeb   :  { %v128_v19 = vadd.f32 %v138_v15, %v119_v18 }
  0xec   :  { %131 = vst.msk [vmem:[%s224_s3 + $0x8] sm:$0xff] %vm18_vm1, %v129_v17 }
  0xed   :  { %130 = vst.msk [vmem:[%s224_s3] sm:$0xff] %vm18_vm1, %v128_v19 }

// kernel: decoder_forward.26
= control target key start
LH: loop header
LB: loop body
LE: loop exit
PB: predicated region body
PF: predicated region fallthrough
CT: control target
= control target key end

     0   :  { %vm22_vm0 = vcmask 261120   ;;  %vm177_vm5 = vcmask 523264   ;;  %s291_s0 = inlined_call_operand.vmem [shape: f32[16,32], index: 0, kind: input, shape index: {}]   ;;  %s292_s3 = inlined_call_operand.vmem [shape: f32[32,64], index: 3, kind: input, shape index: {}]   ;;  %s293_s1 = inlined_call_operand.vmem [shape: f32[1,32], index: 1, kind: input, shape index: {}]   ;;  %s294_s2 = inlined_call_operand.vmem [shape: f32[1,32], index: 2, kind: input, shape index: {}]   ;;  %s295_s4 = inlined_call_operand.vmem [shape: f32[1,64], index: 4, kind: input, shape index: {}]   ;;  %s296_s5 = inlined_call_operand.vmem [shape: f32[16,64], index: 5, kind: output, shape index: {}]  }
   0x1   :  { %v20_v0 = vld [vmem:[%s291_s0] sm:$0xff]  ;;  %v21_v1 = vld [vmem:[%s291_s0 + $0x8] sm:$0xff]  ;;  %v85_v16 = vld [vmem:[%s292_s3 + $0x10] sm:$0xff] }
   0x2   :  { %v23_v2 = vsel %vm22_vm0, %v20_v0, 0.0  ;;  %v26_v3 = vsel %vm22_vm0, %v21_v1, 0.0  ;;  %v83_v14 = vld [vmem:[%s292_s3] sm:$0xff]  ;;  %v84_v15 = vld [vmem:[%s292_s3 + $0x8] sm:$0xff]  ;;  %v86_v18 = vld [vmem:[%s292_s3 + $0x18] sm:$0xff] }
   0x3   :  { %24 = vadd.xlane.f32.xlu0 %v23_v2  ;;  %v206_v17 = vpack.c.bf16 %v84_v15, %v83_v14  ;;  %v210_v19 = vpack.c.bf16 %v86_v18, %v85_v16  ;;  %v184_v36 = vld [vmem:[%s293_s1] ss:$0 sm:$0xff] }
   0x4   :  { %v185_v39 = vld [vmem:[%s294_s2] ss:$0 sm:$0xff] }
   0x5   :  { %207 = vmatprep.subr.bf16.mxu0 %v206_v17  ;;  %v186_v46 = vld [vmem:[%s295_s4] ss:$0 sm:$0xff] }
   0x6   :  { %209 = vmatpush3.bf16.msra.mxu0 %v206_v17 }
   0x7   :  { %27 = vadd.xlane.f32.xlu0 %v26_v3  ;;  %211 = vmatprep.subr.bf16.mxu0 %v210_v19 }
   0xa   :  { %213 = vmatpush3.bf16.msra.mxu0 %v210_v19 }
  0x90   :  { %v25_v4 = vpop.xlane.xlu0 %24 }
  0x91   :  { %v30_v5 = vmul.f32 0.03125, %v25_v4 }
  0x93   :  { %v32_v6 = vsub.f32 %v20_v0, %v30_v5 }
  0x94   :  { %v28_v7 = vpop.xlane.xlu0 %27 }
  0x95   :  { %v31_v8 = vmul.f32 0.03125, %v28_v7  ;;  %v34_v9 = vmul.f32 %v32_v6, %v32_v6  ;;  %v66_v37 = vmul.f32 %v184_v36, %v32_v6 }
  0x97   :  { %v33_v10 = vsub.f32 %v21_v1, %v31_v8  ;;  %v36_v11 = vsel %vm22_vm0, %v34_v9, 0.0 }
  0x98   :  { %37 = vadd.xlane.f32.xlu1 %v36_v11 }
  0x99   :  { %v35_v12 = vmul.f32 %v33_v10, %v33_v10  ;;  %v67_v41 = vmul.f32 %v184_v36, %v33_v10 }
  0x9b   :  { %v39_v13 = vsel %vm22_vm0, %v35_v12, 0.0 }
  0x9c   :  { %40 = vadd.xlane.f32.xlu1 %v39_v13 }
 0x125   :  { %v38_v20 = vpop.xlane.xlu1 %37 }
 0x126   :  { %v43_v21 = vmul.f32 0.032258064, %v38_v20 }
 0x128   :  { %214 = vrsqrt.f32 %v43_v21  ;;  %vm47_vm1 = vcmp.eq.f32.partialorder %v43_v21, inf  ;;  %v50_v26 = vand.u32 2147483648, %v43_v21  ;;  %vm49_vm2 = vcmp.eq.f32.partialorder %v43_v21, 0.0 }
 0x129   :  { %v41_v22 = vpop.xlane.xlu1 %40 }
 0x12a   :  { %v44_v23 = vmul.f32 0.032258064, %v41_v22 }
 0x12c   :  { %216 = vrsqrt.f32 %v44_v23  ;;  %vm54_vm3 = vcmp.eq.f32.partialorder %v44_v23, inf  ;;  %v57_v32 = vand.u32 2147483648, %v44_v23  ;;  %vm56_vm4 = vcmp.eq.f32.partialorder %v44_v23, 0.0 }
 0x132   :  { %v215_v24 = vpop.eup %214 }
 0x133   :  { %v46_v25 = vmul.f32 %v215_v24, %v43_v21 }
 0x135   :  { %v48_v27 = vsel %vm47_vm1, %v43_v21, %v46_v25 }
 0x136   :  { %v217_v28 = vpop.eup %216  ;;  %v51_v29 = vsel %vm49_vm2, %v50_v26, %v48_v27 }
 0x137   :  { %v53_v30 = vmul.f32 %v217_v28, %v44_v23  ;;  %v68_v31 = vadd.f32 1e-06, %v51_v29 }
 0x139   :  { %v55_v33 = vsel %vm54_vm3, %v44_v23, %v53_v30  ;;  %218 = vrcp.f32 %v68_v31 }
 0x13a   :  { %v58_v34 = vsel %vm56_vm4, %v57_v32, %v55_v33 }
 0x13b   :  { %v69_v35 = vadd.f32 1e-06, %v58_v34 }
 0x13d   :  { %220 = vrcp.f32 %v69_v35 }
 0x143   :  { %v219_v38 = vpop.eup %218 }
 0x144   :  { %v71_v40 = vmul.f32 %v219_v38, %v66_v37 }
 0x146   :  { %v81_v42 = vadd.f32 %v185_v39, %v71_v40 }
 0x147   :  { %v221_v43 = vpop.eup %220 }
 0x148   :  { %v73_v44 = vmul.f32 %v221_v43, %v67_v41  ;;  %203 = vmatprep.mubr.msk.f32.mxu0 %vm22_vm0, %v81_v42 }
 0x14a   :  { %v82_v45 = vadd.f32 %v185_v39, %v73_v44 }
 0x14c   :  { %204 = vmatmul.mubr.msk.f32.vlgmr.msra.gmra.mrb[0].mxu0 %vm22_vm0, %v82_v45 }
 0x21f   :  { %v205_v47 = vpop.f32.mrb[0].mxu0 }
 0x220   :  { %v172_v48 = vadd.f32 %v205_v47, %v186_v46  ;;  %v166_v49 = vpop.f32.mrb[1].mxu0 }
 0x221   :  { %v167_v50 = vadd.f32 %v186_v46, %v166_v49 }
 0x222   :  { %v176_v51 = vmax.f32 %v172_v48, 0.0 }
 0x223   :  { %v175_v52 = vmax.f32 %v167_v50, 0.0 }
 0x224   :  { %179 = vst.msk [vmem:[%s296_s5 + $0x8] sm:$0xff] %vm177_vm5, %v176_v51 }
 0x225   :  { %178 = vst.msk [vmem:[%s296_s5] sm:$0xff] %vm177_vm5, %v175_v52 }

// kernel: decoder_forward.27
= control target key start
LH: loop header
LB: loop body
LE: loop exit
PB: predicated region body
PF: predicated region fallthrough
CT: control target
= control target key end

     0   :  { %vm21_vm0 = vcmask 261120   ;;  %vm36_vm1 = vcmask 523264   ;;  %v196_v3 = vmov 0.0   ;;  %s275_s1 = inlined_call_operand.vmem [shape: f32[64,32], index: 1, kind: input, shape index: {}]   ;;  %s276_s0 = inlined_call_operand.vmem [shape: f32[16,64], index: 0, kind: input, shape index: {}]   ;;  %s277_s2 = inlined_call_operand.vmem [shape: f32[1,32], index: 2, kind: input, shape index: {}]   ;;  %s278_s3 = inlined_call_operand.vmem [shape: f32[16,32], index: 3, kind: input, shape index: {}]   ;;  %s279_s4 = inlined_call_operand.vmem [shape: f32[16,32], index: 4, kind: output, shape index: {}]  }
   0x1   :  { %v28_v0 = vld [vmem:[%s275_s1] sm:$0xff]  ;;  %v29_v1 = vld [vmem:[%s275_s1 + $0x8] sm:$0xff]  ;;  %v30_v2 = vld [vmem:[%s275_s1 + $0x10] sm:$0xff]  ;;  %23 = vst.msk [vmem:[#allocation2 + $0x8] sm:$0xff] %vm21_vm0, %v196_v3 }
   0x2   :  { %22 = vst.msk [vmem:[#allocation2] sm:$0xff] %vm21_vm0, %v196_v3  ;;  %v179_v4 = vpack.c.bf16 %v29_v1, %v28_v0  ;;  %v31_v5 = vld [vmem:[%s275_s1 + $0x18] sm:$0xff]  ;;  %v32_v7 = vld [vmem:[%s275_s1 + $0x20] sm:$0xff]  ;;  %v33_v8 = vld [vmem:[%s275_s1 + $0x28] sm:$0xff] }
   0x3   :  { %v183_v6 = vpack.c.bf16 %v31_v5, %v30_v2  ;;  %v26_v9 = vld [vmem:[%s276_s0] sm:$0xff]  ;;  %v187_v10 = vpack.c.bf16 %v33_v8, %v32_v7  ;;  %v34_v11 = vld [vmem:[%s275_s1 + $0x30] sm:$0xff]  ;;  %v35_v12 = vld [vmem:[%s275_s1 + $0x38] sm:$0xff] }
   0x4   :  { %180 = vmatprep.subr.bf16.mxu0 %v179_v4  ;;  %176 = vmatprep.mubr.msk.f32.mxu0 %vm36_vm1, %v26_v9  ;;  %v191_v13 = vpack.c.bf16 %v35_v12, %v34_v11  ;;  %v27_v14 = vld [vmem:[%s276_s0 + $0x8] sm:$0xff]  ;;  %v149_v21 = vld [vmem:[%s277_s2] ss:$0 sm:$0xff] }
   0x5   :  { %182 = vmatpush3.bf16.msra.mxu0 %v179_v4  ;;  %v138_v23 = vld [vmem:[%s278_s3 + $0x8] sm:$0xff]  ;;  %v137_v25 = vld [vmem:[%s278_s3] sm:$0xff] }
   0x6   :  { %184 = vmatprep.subr.bf16.mxu0 %v183_v6 }
   0x8   :  { %v25_v15 = vld [vmem:[#allocation2 + $0x8] sm:$0xff] }
   0x9   :  { %186 = vmatpush3.bf16.msra.mxu0 %v183_v6  ;;  %v24_v16 = vld [vmem:[#allocation2] sm:$0xff] }
   0xa   :  { %188 = vmatprep.subr.bf16.mxu0 %v187_v10 }
   0xd   :  { %190 = vmatpush3.bf16.msra.mxu0 %v187_v10 }
   0xe   :  { %192 = vmatprep.subr.bf16.mxu0 %v191_v13 }
  0x11   :  { %194 = vmatpush3.bf16.msra.mxu0 %v191_v13 }
  0x14   :  { %177 = vmatmul.mubr.msk.f32.vlgmr.msra.gmra.mrb[0].mxu0 %vm36_vm1, %v27_v14 }
  0xe7   :  { %v178_v17 = vpop.f32.mrb[0].mxu0 }
  0xe8   :  { %v119_v18 = vadd.f32 %v178_v17, %v25_v15  ;;  %v109_v19 = vpop.f32.mrb[1].mxu0 }
  0xe9   :  { %v118_v20 = vadd.f32 %v109_v19, %v24_v16 }
  0xea   :  { %122 = vst.msk [vmem:[#allocation2 + $0x8] sm:$0xff] %vm21_vm0, %v119_v18 }
  0xeb   :  { %121 = vst.msk [vmem:[#allocation2] sm:$0xff] %vm21_vm0, %v118_v20 }
  0xf1   :  { %v127_v22 = vld [vmem:[#allocation2 + $0x8] sm:$0xff] }
  0xf2   :  { %v136_v24 = vadd.f32 %v149_v21, %v127_v22  ;;  %v126_v26 = vld [vmem:[#allocation2] sm:$0xff] }
  0xf3   :  { %v135_v27 = vadd.f32 %v149_v21, %v126_v26 }
  0xf4   :  { %v140_v28 = vadd.f32 %v138_v23, %v136_v24 }
  0xf5   :  { %v139_v29 = vadd.f32 %v137_v25, %v135_v27 }
  0xf6   :  { %142 = vst.msk [vmem:[%s279_s4 + $0x8] sm:$0xff] %vm21_vm0, %v140_v28 }
  0xf7   :  { %141 = vst.msk [vmem:[%s279_s4] sm:$0xff] %vm21_vm0, %v139_v29 }

// kernel: decoder_forward.24
= control target key start
LH: loop header
LB: loop body
LE: loop exit
PB: predicated region body
PF: predicated region fallthrough
CT: control target
= control target key end

     0   :  { %s1123_s12 = smov 0   ;;  %s1220_s0 = inlined_call_operand.vmem [shape: f32[2,8,32], index: 0, kind: input, shape index: {}]   ;;  %s1221_s1 = inlined_call_operand.vmem [shape: f32[2,8,64], index: 1, kind: input, shape index: {}]   ;;  %s1222_s2 = inlined_call_operand.vmem [shape: s32[2,1,8], index: 2, kind: input, shape index: {}]   ;;  %s1223_s3 = inlined_call_operand.vmem [shape: f32[2,8,32], index: 3, kind: output, shape index: {}]  }
   0x1 LB: > { %s967_s13 = sadd.s32 4294967295, %s1088_s12   ;;  %p971_p0 = scmp.ge.s32.totalorder %s1088_s12, 1  ;;  %s1088_s12 = sphi %s1123_s12, %s13_s12  }
   0x2   : > { %p153_p1 = scmp.lt.s32.totalorder %s1088_s12, 3 }
   0x4   : > { %p154_p2 = pnand %p971_p0, %p153_p1 }
   0x5   : > { %p182_p3 = scmp.lt.s32.totalorder (!%p154_p2), %s967_s13, 1  ;;  %v1090_v0 = vmov (!%p154_p2), 0.0   ;;  %vm1091_vm0 = vmmov (!%p154_p2), 0   ;;  %vm200_vm1 = vcmask (!%p154_p2), 64512   ;;  %v280_v3 = vlaneseq (!%p154_p2)  ;;  %s1093_s24 = smov (!%p154_p2), 96  }
   0x6   : > { %157 = sbr.rel (%p154_p2) target bundleno = 1419 (0x58b), region = 32  ;;  %1005 = vmatprep.subr.mxu0 (!%p154_p2), %v1090_v0  ;;  %1007 = vmatprep.mubr.msk.f32.mxu0 (!%p154_p2), %vm1091_vm0, %v1090_v0  ;;  %v1092_v7 = vmov (!%p154_p2), 0   ;;  %s1094_s25 = smov (!%p154_p2), 120   ;;  %vm887_vm4 = vcmask (!%p154_p2), 130048   ;;  %vm889_vm5 = vcmask (!%p154_p2), 195584   ;;  %vm891_vm6 = vcmask (!%p154_p2), 261120  }
   0x7   : > { %1010 = vmatprep.subr.mxu1 (!%p154_p2), %v1090_v0  ;;  %1012 = vmatprep.mubr.msk.f32.mxu1 (!%p154_p2), %vm1091_vm0, %v1090_v0  ;;  %v281_v5 = vshrl.u32 (!%p154_p2), %v280_v3, 7  ;;  %s1095_s26 = smov (!%p154_p2), 112   ;;  %s1096_s27 = smov (!%p154_p2), 104  }
   0x8   : > { %s1097_s28 = smov (!%p154_p2), 88   ;;  %s1098_s29 = smov (!%p154_p2), 72  }
   0x9   : > { %v282_v6 = vsub.s32 (!%p154_p2), 0, %v281_v5  ;;  %s1099_s30 = smov (!%p154_p2), 80   ;;  %s1100_s4 = smov (!%p154_p2), 8  }
   0xa   : > { %s1101_s5 = smov (!%p154_p2), 16   ;;  %s1102_s6 = smov (!%p154_p2), 24  }
   0xd   : > { %s1225_s13 = smov (!%p182_p3, %s967_s13), 1 }
   0xe   : > { %s1137_s14 = sshll.u32 %s1225_s13, 3  ;;  %s192_s23 = scalar_lea.vmem %s1222_s2, %s1225_s13 }
   0xf   : > { %s189_s17 = scalar_lea.vmem %s1221_s1, %s1137_s14  ;;  %s185_s20 = scalar_lea.vmem %s1220_s0, %s1137_s14  ;;  %v199_v4 = vld [vmem:[%s192_s23] sm:$0x1] }
  0x10   : > { %v1147_v1 = vld [vmem:[%s189_s17] sm:$0xff]  ;;  %vm278_vm2 = vcmp.eq.s32.totalorder %v199_v4, 0  ;;  %s196_s9 = scalar_lea.vmem %s1223_s3, %s1137_s14 }
  0x11   : > { %1006 = vmatpush3.xpose.msk.msra.mxu0 %vm200_vm1, %v1147_v1  ;;  %v197_v2 = vld [vmem:[%s185_s20] sm:$0xff]  ;;  %v279_v8 = vsel %vm278_vm2, 1, %v1092_v7  ;;  %297 = vrot.lane.b32.xlu1 %v1147_v1, %s1093_s24 }
  0x12   : > { %1020 = vmatprep.subr.mxu0 %v1090_v0  ;;  %v1158_v9 = vrot.slane %v279_v8, %v282_v6 }
  0x14   : > { %1008 = vmatmul.mubr.msk.f32.vlgmr.msra.gmra.mrb[0].mxu0 %vm200_vm1, %v197_v2  ;;  %vm284_vm3 = vcmp.eq.s32.totalorder %v1158_v9, 1 }
  0x15   : > { %1022 = vmatprep.mubr.msk.f32.mxu0 %vm1091_vm0, %v1090_v0  ;;  %375 = vrot.lane.b32.xlu1 %v1147_v1, %s1094_s25 }
  0x19   : > { %542 = vrot.lane.b32.xlu1 %v1147_v1, %s1095_s26 }
  0x1d   : > { %540 = vrot.lane.b32.xlu1 %v197_v2, %s1095_s26 }
  0x21   : > { %709 = vrot.lane.b32.xlu1 %v1147_v1, %s1096_s27 }
  0x25   : > { %707 = vrot.lane.b32.xlu1 %v197_v2, %s1096_s27 }
  0x83   : > { %v298_v20 = vpop.permute.xlu1 %297 }
  0x84   : > { %1011 = vmatpush3.msra.mxu1 %v298_v20 }
  0x85   : > { %1015 = vmatprep.subr.mxu1 %v1090_v0 }
  0x87   : > { %v376_v21 = vpop.permute.xlu1 %375 }
  0x8b   : > { %v543_v23 = vpop.permute.xlu1 %542 }
  0x8f   : > { %v541_v25 = vpop.permute.xlu1 %540 }
  0x93   : > { %v710_v28 = vpop.permute.xlu1 %709 }
  0x97   : > { %v708_v29 = vpop.permute.xlu1 %707 }
  0xe7   : > { %v273_v10 = vpop.f32.mrb[0].mxu0 }
  0xe8   : > { %v277_v11 = vmul.f32 0.35355338, %v273_v10  ;;  %v1009_v12 = vpop.f32.mrb[1].mxu0 }
  0xea   : > { %v285_v13 = vsel %vm284_vm3, -1e+09, %v277_v11 }
  0xeb   : > { %v286_v14 = vsel %vm200_vm1, %v285_v13, -inf }
  0xec   : > { %287 = vmax.xlane.f32.xlu0 %v286_v14 }
 0x179   : > { %v288_v15 = vpop.xlane.xlu0 %287 }
 0x17a   : > { %v289_v16 = vsub.f32 %v285_v13, %v288_v15 }
 0x17c   : > { %v290_v17 = vmul.f32 1.442695, %v289_v16 }
 0x17e   : > { %1066 = vpow2.f32 %v290_v17 }
 0x188   : > { %v1067_v18 = vpop.eup %1066 }
 0x189   : > { %v292_v19 = vsel %vm200_vm1, %v1067_v18, 0.0 }
 0x18a   : > { %293 = vadd.xlane.f32.xlu0 %v292_v19 }
 0x1a0   : > { %373 = vrot.lane.b32.xlu0 %v197_v2, %s1094_s25 }
 0x217   : > { %v294_v22 = vpop.xlane.xlu0 %293 }
 0x218   : > { %1068 = vrcp.f32 %v294_v22 }
 0x21b   : > { %v374_v27 = vpop.permute.xlu0 %373 }
 0x222   : > { %v1069_v24 = vpop.eup %1068 }
 0x223   : > { %v296_v26 = vmul.f32 %v1069_v24, %v1067_v18 }
 0x225   : > { %1013 = vmatmul.mubr.msk.f32.vlgmr.msra.gmra.mrb[0].mxu1 %vm200_vm1, %v296_v26 }
 0x226   : > { %1016 = vmatpush3.xpose.msk.msra.mxu1 %vm200_vm1, %v376_v21  ;;  %1017 = vmatprep.mubr.msk.f32.mxu1 %vm1091_vm0, %v1090_v0 }
 0x227   : > { %1025 = vmatprep.subr.mxu1 %v1090_v0 }
 0x229   : > { %1018 = vmatmul.mubr.msk.f32.vlgmr.msra.gmra.mrb[2].mxu1 %vm200_vm1, %v374_v27 }
 0x22a   : > { %1026 = vmatpush3.xpose.msk.msra.mxu1 %vm200_vm1, %v543_v23  ;;  %1027 = vmatprep.mubr.msk.f32.mxu1 %vm1091_vm0, %v1090_v0 }
 0x22b   : > { %1035 = vmatprep.subr.mxu1 %v1090_v0 }
 0x22d   : > { %1028 = vmatmul.mubr.msk.f32.vlgmr.msra.gmra.mrb[4].mxu1 %vm200_vm1, %v541_v25 }
 0x22e   : > { %1036 = vmatpush3.xpose.msk.msra.mxu1 %vm200_vm1, %v710_v28  ;;  %1037 = vmatprep.mubr.msk.f32.mxu1 %vm1091_vm0, %v1090_v0 }
 0x231   : > { %1038 = vmatmul.mubr.msk.f32.vlgmr.msra.gmra.mrb[6].mxu1 %vm200_vm1, %v708_v29 }
 0x2f8   : > { %v1185_v30 = vpop.f32.mrb[0].mxu1 }
 0x2f9   : > { %v1014_v31 = vpop.f32.mrb[1].mxu1 }
 0x2fc   : > { %v447_v32 = vpop.f32.mrb[2].mxu1 }
 0x2fd   : > { %v451_v33 = vmul.f32 0.35355338, %v447_v32  ;;  %v1019_v34 = vpop.f32.mrb[3].mxu1 }
 0x2ff   : > { %v452_v35 = vsel %vm284_vm3, -1e+09, %v451_v33 }
 0x300   : > { %v614_v36 = vpop.f32.mrb[4].mxu1  ;;  %v453_v37 = vsel %vm200_vm1, %v452_v35, -inf }
 0x301   : > { %v618_v38 = vmul.f32 0.35355338, %v614_v36  ;;  %454 = vmax.xlane.f32.xlu1 %v453_v37  ;;  %v1029_v39 = vpop.f32.mrb[5].mxu1 }
 0x303   : > { %v619_v40 = vsel %vm284_vm3, -1e+09, %v618_v38 }
 0x304   : > { %v781_v41 = vpop.f32.mrb[6].mxu1  ;;  %v620_v42 = vsel %vm200_vm1, %v619_v40, -inf }
 0x305   : > { %v785_v43 = vmul.f32 0.35355338, %v781_v41  ;;  %621 = vmax.xlane.f32.xlu0 %v620_v42  ;;  %v1039_v44 = vpop.f32.mrb[7].mxu1 }
 0x307   : > { %v786_v45 = vsel %vm284_vm3, -1e+09, %v785_v43 }
 0x308   : > { %v787_v46 = vsel %vm200_vm1, %v786_v45, -inf }
 0x309   : > { %788 = vmax.xlane.f32.xlu1 %v787_v46 }
 0x31a   : > { %464 = vrot.lane.b32.xlu1 %v1147_v1, %s1097_s28 }
 0x38e   : > { %v455_v47 = vpop.xlane.xlu1 %454 }
 0x38f   : > { %v456_v48 = vsub.f32 %v452_v35, %v455_v47 }
 0x391   : > { %v457_v49 = vmul.f32 1.442695, %v456_v48 }
 0x392   : > { %v622_v50 = vpop.xlane.xlu0 %621 }
 0x393   : > { %1070 = vpow2.f32 %v457_v49  ;;  %v623_v51 = vsub.f32 %v619_v40, %v622_v50 }
 0x395   : > { %v624_v52 = vmul.f32 1.442695, %v623_v51 }
 0x396   : > { %v789_v53 = vpop.xlane.xlu1 %788 }
 0x397   : > { %1072 = vpow2.f32 %v624_v52  ;;  %v790_v54 = vsub.f32 %v786_v45, %v789_v53 }
 0x399   : > { %v791_v55 = vmul.f32 1.442695, %v790_v54 }
 0x39a   : > { %v465_v56 = vpop.permute.xlu1 %464 }
 0x39b   : > { %1074 = vpow2.f32 %v791_v55  ;;  %1021 = vmatpush3.msra.mxu0 %v465_v56 }
 0x39c   : > { %1030 = vmatprep.subr.mxu0 %v1090_v0 }
 0x39d   : > { %v1071_v57 = vpop.eup %1070 }
 0x39e   : > { %v459_v58 = vsel %vm200_vm1, %v1071_v57, 0.0 }
 0x39f   : > { %460 = vadd.xlane.f32.xlu0 %v459_v58 }
 0x3a1   : > { %v1073_v59 = vpop.eup %1072 }
 0x3a2   : > { %v626_v60 = vsel %vm200_vm1, %v1073_v59, 0.0 }
 0x3a3   : > { %627 = vadd.xlane.f32.xlu1 %v626_v60 }
 0x3a5   : > { %v1075_v61 = vpop.eup %1074 }
 0x3a6   : > { %v793_v62 = vsel %vm200_vm1, %v1075_v61, 0.0 }
 0x3a7   : > { %794 = vadd.xlane.f32.xlu0 %v793_v62 }
 0x3b4   : > { %798 = vrot.lane.b32.xlu1 %v1147_v1, %s1098_s29 }
 0x3bd   : > { %631 = vrot.lane.b32.xlu0 %v1147_v1, %s1099_s30 }
 0x42c   : > { %v461_v63 = vpop.xlane.xlu0 %460 }
 0x42d   : > { %1076 = vrcp.f32 %v461_v63 }
 0x430   : > { %v628_v2 = vpop.xlane.xlu1 %627 }
 0x431   : > { %1078 = vrcp.f32 %v628_v2 }
 0x434   : > { %v795_v3 = vpop.xlane.xlu0 %794  ;;  %v799_v1 = vpop.permute.xlu1 %798 }
 0x435   : > { %1080 = vrcp.f32 %v795_v3 }
 0x437   : > { %v1077_v4 = vpop.eup %1076 }
 0x438   : > { %v463_v5 = vmul.f32 %v1077_v4, %v1071_v57  ;;  %v632_v6 = vpop.permute.xlu0 %631 }
 0x43a   : > { %1023 = vmatmul.mubr.msk.f32.vlgmr.msra.gmra.mrb[2].mxu0 %vm200_vm1, %v463_v5 }
 0x43b   : > { %v1079_v7 = vpop.eup %1078  ;;  %1031 = vmatpush3.msra.mxu0 %v632_v6  ;;  %1032 = vmatprep.mubr.msk.f32.mxu0 %vm1091_vm0, %v1090_v0 }
 0x43c   : > { %v630_v8 = vmul.f32 %v1079_v7, %v1073_v59  ;;  %1040 = vmatprep.subr.mxu0 %v1090_v0 }
 0x43e   : > { %1033 = vmatmul.mubr.msk.f32.vlgmr.msra.gmra.mrb[4].mxu0 %vm200_vm1, %v630_v8 }
 0x43f   : > { %v1081_v9 = vpop.eup %1080  ;;  %1041 = vmatpush3.msra.mxu0 %v799_v1  ;;  %1042 = vmatprep.mubr.msk.f32.mxu0 %vm1091_vm0, %v1090_v0 }
 0x440   : > { %v797_v10 = vmul.f32 %v1081_v9, %v1075_v61 }
 0x442   : > { %1043 = vmatmul.mubr.msk.f32.vlgmr.msra.gmra.mrb[6].mxu0 %vm200_vm1, %v797_v10 }
 0x50d   : > { %v536_v11 = vpop.f32.mrb[2].mxu0 }
 0x50e   : > { %875 = vrot.lane.b32.xlu1 %v536_v11, %s1100_s4  ;;  %v1024_v12 = vpop.f32.mrb[3].mxu0 }
 0x511   : > { %v703_v13 = vpop.f32.mrb[4].mxu0 }
 0x512   : > { %879 = vrot.lane.b32.xlu0 %v703_v13, %s1101_s5  ;;  %v1034_v14 = vpop.f32.mrb[5].mxu0 }
 0x515   : > { %v870_v15 = vpop.f32.mrb[6].mxu0 }
 0x516   : > { %883 = vrot.lane.b32.xlu1 %v870_v15, %s1102_s6  ;;  %v1044_v16 = vpop.f32.mrb[7].mxu0 }
 0x580   : > { %v876_v17 = vpop.permute.xlu1 %875 }
 0x581   : > { %v886_v0 = vsel %vm200_vm1, %v1185_v30, %v876_v17 }
 0x584   : > { %v880_v18 = vpop.permute.xlu0 %879 }
 0x585   : > { %v888_v19 = vsel %vm887_vm4, %v886_v0, %v880_v18 }
 0x588   : > { %v884_v20 = vpop.permute.xlu1 %883 }
 0x589   : > { %v890_v21 = vsel %vm889_vm5, %v888_v19, %v884_v20 }
 0x58a   : > { %892 = vst.msk [vmem:[%s196_s9] sm:$0xff] %vm891_vm6, %v890_v21 }
 0x58b PF: > { %s13_s12 = sadd.s32 1, %s1088_s12  }
 0x58c   : > { %p10_p4 = scmp.ge.s32.totalorder %s13_s12, 4  }
 0x58e   :  { %12 = sbr.rel (!%p10_p4) target bundleno = 1 (0x1), region = 68 }

// kernel: decoder_forward.37
= control target key start
LH: loop header
LB: loop body
LE: loop exit
PB: predicated region body
PF: predicated region fallthrough
CT: control target
= control target key end

     0   :  { %vm17_vm0 = vcmask 261120   ;;  %s186_s0 = inlined_call_operand.vmem [shape: f32[16,32], index: 0, kind: input, shape index: {}]   ;;  %s187_s1 = inlined_call_operand.vmem [shape: f32[1,32], index: 1, kind: input, shape index: {}]   ;;  %s188_s2 = inlined_call_operand.vmem [shape: f32[1,32], index: 2, kind: input, shape index: {}]   ;;  %s189_s3 = inlined_call_operand.hbm [shape: f32[16,32], index: 3, kind: output, shape index: {}]  }
   0x1   :  { %v15_v0 = vld [vmem:[%s186_s0] sm:$0xff]  ;;  %v16_v1 = vld [vmem:[%s186_s0 + $0x8] sm:$0xff] }
   0x2   :  { %v18_v2 = vsel %vm17_vm0, %v15_v0, 0.0 }
   0x3   :  { %8 = vsyncpa [#allocation3], 0  ;;  %19 = vadd.xlane.f32.xlu0 %v18_v2  ;;  %v21_v3 = vsel %vm17_vm0, %v16_v1, 0.0  ;;  %v96_v30 = vld [vmem:[%s187_s1] ss:$0 sm:$0xff]  ;;  %s133_s19 = smov [#allocation2]  }
   0x4   :  { %v97_v33 = vld [vmem:[%s188_s2] ss:$0 sm:$0xff]  ;;  %s85_s20 = sshll.u32 %s133_s19, 4  ;;  %s86_s20 = int_to_ptr.vmem [resolvable:$true] %s85_s20 }
   0x5   :  { %s109_s1 = scalar_lea.vmem %s86_s20, 256  ;;  %p114_p1 = scmp.lt.s32.totalorder %s86_s20, %s86_s20 }
   0x6   :  { %p110_p0 = scmp.ne.s32.totalorder %s86_s20, %s109_s1  ;;  %p115_p2 = scmp.lt.s32.totalorder %s109_s1, %s109_s1 }
   0x7   :  { %22 = vadd.xlane.f32.xlu0 %v21_v3 }
   0x8   :  { %p116_p3 = por %p115_p2, %p114_p1 }
   0xa   :  { %p117_p4 = pnand %p116_p3, %p110_p0 }
  0x90   :  { %v20_v4 = vpop.xlane.xlu0 %19 }
  0x91   :  { %v25_v5 = vmul.f32 0.03125, %v20_v4 }
  0x93   :  { %v27_v6 = vsub.f32 %v15_v0, %v25_v5 }
  0x94   :  { %v23_v7 = vpop.xlane.xlu0 %22 }
  0x95   :  { %v26_v8 = vmul.f32 0.03125, %v23_v7  ;;  %v29_v9 = vmul.f32 %v27_v6, %v27_v6  ;;  %v61_v31 = vmul.f32 %v96_v30, %v27_v6 }
  0x97   :  { %v28_v10 = vsub.f32 %v16_v1, %v26_v8  ;;  %v31_v11 = vsel %vm17_vm0, %v29_v9, 0.0 }
  0x98   :  { %32 = vadd.xlane.f32.xlu1 %v31_v11 }
  0x99   :  { %v30_v12 = vmul.f32 %v28_v10, %v28_v10  ;;  %v62_v35 = vmul.f32 %v96_v30, %v28_v10 }
  0x9b   :  { %v34_v13 = vsel %vm17_vm0, %v30_v12, 0.0 }
  0x9c   :  { %35 = vadd.xlane.f32.xlu1 %v34_v13 }
 0x125   :  { %v33_v14 = vpop.xlane.xlu1 %32 }
 0x126   :  { %v38_v15 = vmul.f32 0.032258064, %v33_v14 }
 0x128   :  { %101 = vrsqrt.f32 %v38_v15  ;;  %vm42_vm1 = vcmp.eq.f32.partialorder %v38_v15, inf  ;;  %v45_v20 = vand.u32 2147483648, %v38_v15  ;;  %vm44_vm2 = vcmp.eq.f32.partialorder %v38_v15, 0.0 }
 0x129   :  { %v36_v16 = vpop.xlane.xlu1 %35 }
 0x12a   :  { %v39_v17 = vmul.f32 0.032258064, %v36_v16 }
 0x12c   :  { %103 = vrsqrt.f32 %v39_v17  ;;  %vm49_vm3 = vcmp.eq.f32.partialorder %v39_v17, inf  ;;  %v52_v26 = vand.u32 2147483648, %v39_v17  ;;  %vm51_vm4 = vcmp.eq.f32.partialorder %v39_v17, 0.0 }
 0x132   :  { %v102_v18 = vpop.eup %101 }
 0x133   :  { %v41_v19 = vmul.f32 %v102_v18, %v38_v15 }
 0x135   :  { %v43_v21 = vsel %vm42_vm1, %v38_v15, %v41_v19 }
 0x136   :  { %v104_v22 = vpop.eup %103  ;;  %v46_v23 = vsel %vm44_vm2, %v45_v20, %v43_v21 }
 0x137   :  { %v63_v24 = vadd.f32 1e-06, %v46_v23  ;;  %v48_v25 = vmul.f32 %v104_v22, %v39_v17 }
 0x139   :  { %105 = vrcp.f32 %v63_v24  ;;  %v50_v27 = vsel %vm49_vm3, %v39_v17, %v48_v25 }
 0x13a   :  { %v53_v28 = vsel %vm51_vm4, %v52_v26, %v50_v27 }
 0x13b   :  { %v64_v29 = vadd.f32 1e-06, %v53_v28 }
 0x13d   :  { %107 = vrcp.f32 %v64_v29 }
 0x143   :  { %v106_v32 = vpop.eup %105 }
 0x144   :  { %v66_v34 = vmul.f32 %v106_v32, %v61_v31 }
 0x146   :  { %v76_v36 = vadd.f32 %v97_v33, %v66_v34 }
 0x147   :  { %v108_v37 = vpop.eup %107 }
 0x148   :  { %v68_v38 = vmul.f32 %v108_v37, %v62_v35  ;;  %78 = vst.msk [vmem:[#allocation2] sm:$0xff] %vm17_vm0, %v76_v36 }
 0x14a   :  { %v77_v39 = vadd.f32 %v97_v33, %v68_v38 }
 0x14c   :  { %79 = vst.msk [vmem:[#allocation2 + $0x8] sm:$0xff] %vm17_vm0, %v77_v39 }
 0x14d   :  { %120 = shalt.err (!%p117_p4)
}
 0x14e   :  { %s121_s22 = scalar_lea.hbm %s189_s3, 256 }
 0x14f   :  { %p122_p5 = scmp.ne.s32.totalorder %s189_s3, %s121_s22  ;;  %p125_p6 = scmp.lt.u32.totalorder %s121_s22, %s189_s3 }
 0x151   :  { %p127_p7 = pnand %p125_p6, %p122_p5 }
 0x153   :  { %130 = shalt.err (!%p127_p7)
}
 0x154   :  { %s134_s27 = smov 128   ;;  %s135_s28 = smov 8  }
 0x155   :  { %91 = dma.vmem_to_hbm [thread:$0]  %s86_s20, 256, %s189_s3, [#allocation3], %s134_s27, %s134_s27, %s135_s28  }
 0x156   :  { %131 = dma.done.wait [#allocation3], 256  }
 0x157   :  { %132 = vsyncadd [#allocation3], 4294967040 }
 0x158   :  { %95 = vsyncpa [#allocation3], 1 }

</bundles_post_ra>
